<compile_context>
chip_gen: v7x
topology: tpu7x:2x2x1
jax: 0.10.0
libtpu: 0.0.40
codegen_flags: <defaults>
</compile_context>

<pallas_src>
import functools

import jax
import jax.numpy as jnp
from jax.experimental import pallas as pl
from jax.experimental.pallas import tpu as pltpu

# ---- model configuration (matches the synthetic CNNScan config) ----
INPUT_SIZE = (4, 16, 16)        # (C, H, W)
CONV_CHANNELS = (8, 16)         # enc_conv_layers output channels, 3x3 kernels
KH = KW = 3
ENC_FULL_LAYERS = [32]
OUTPUT_SIZE = 24                # gen_seed_image

H, W = INPUT_SIZE[1], INPUT_SIZE[2]
GRID = H * W                    # 256: flat per-image grid (conv outputs stay on this grid)
OUT_PAD = 128                   # lane-dense padded width of the final output

# Packed-slab row offsets (bf16 slab rows aligned to 16-row tiles, f32 slab to 8-row tiles)
W0_ROW, W1_ROW, FW1_ROW, WSLAB_ROWS = 0, 16, 32, 64
B0_ROW, B1_ROW, FB0_ROW, FB1_ROW, BSLAB_ROWS = 0, 8, 24, 32, 40


# ----------------------------------------------------------------------------
# Fused kernel: conv0 -> relu -> conv1 -> relu -> fc0 -> relu -> fc1 -> relu
# (dropout layers are identity at inference)
# ----------------------------------------------------------------------------
def _encoder_kernel(x_ref, wslab_ref, bslab_ref, fw0_ref, o_ref,
                    y0_ref, flat_ref, *, batch):
    c0 = INPUT_SIZE[0]
    c1, c2 = CONV_CHANNELS
    hid = ENC_FULL_LAYERS[0]
    w2_cols = batch * GRID                         # conv1-output / fc-input columns
    w1_cols = w2_cols + (KH - 1) * W + (KW - 1)    # conv0-output columns

    # ---- static slices of the two coalesced parameter slabs (free views) ----
    w0 = wslab_ref[W0_ROW:W0_ROW + c1, 0:KH * KW * c0]      # (8, 36)   bf16
    w1 = wslab_ref[W1_ROW:W1_ROW + c2, 0:KH * KW * c1]      # (16, 72)  bf16
    fw1 = wslab_ref[FW1_ROW:FW1_ROW + hid, :]               # (32, 128) bf16
    b0 = bslab_ref[B0_ROW:B0_ROW + c1, 0:1]                 # (8, 1)    f32
    b1 = bslab_ref[B1_ROW:B1_ROW + c2, 0:1]                 # (16, 1)   f32
    fb0 = bslab_ref[FB0_ROW:FB0_ROW + 1, 0:hid]             # (1, 32)   f32
    fb1 = bslab_ref[FB1_ROW:FB1_ROW + 1, :]                 # (1, 128)  f32

    # ---- conv0 (4->8, 3x3): 9 taps stacked along contraction -> ONE matmul (K=36) ----
    x_stack = jnp.concatenate(
        [x_ref[:, di * W + dj: di * W + dj + w1_cols]
         for di in range(KH) for dj in range(KW)], axis=0)              # (36, w1_cols) bf16
    acc0 = jnp.dot(w0, x_stack, preferred_element_type=jnp.float32)     # (8, w1_cols) f32
    # bias + ReLU in f32 (Dropout after each conv block is identity at inference)
    y0_ref[...] = jnp.maximum(acc0 + b0, 0.0).astype(jnp.bfloat16)

    # ---- conv1 (8->16, 3x3): ONE matmul (K=72) ----
    y0_stack = jnp.concatenate(
        [y0_ref[:, di * W + dj: di * W + dj + w2_cols]
         for di in range(KH) for dj in range(KW)], axis=0)              # (72, w2_cols) bf16
    acc1 = jnp.dot(w1, y0_stack, preferred_element_type=jnp.float32)    # (16, w2_cols) f32
    y1 = jnp.maximum(acc1 + b1, 0.0).astype(jnp.bfloat16)               # (16, w2_cols) bf16

    # ---- relayout: channel-major (c2, batch*GRID) -> torch-flatten order (batch, c2*GRID)
    # batch*c2 cheap aligned row copies (replaces the previous 32 M=1 MXU round-trips).
    for n in range(batch):
        for c in range(c2):
            flat_ref[n:n + 1, c * GRID:(c + 1) * GRID] = \
                y1[c:c + 1, n * GRID:(n + 1) * GRID]

    # ---- fc0: ONE matmul (batch, 4096) x (4096, 32), f32 bias + ReLU ----
    h0 = jnp.maximum(
        jnp.dot(flat_ref[...], fw0_ref[...],
                preferred_element_type=jnp.float32) + fb0, 0.0)          # (batch, 32)

    # ---- fc1 (+ ReLU per spec: nonlinearity follows every fc, incl. the output layer) ----
    out = jnp.dot(h0.astype(jnp.bfloat16), fw1,
                  preferred_element_type=jnp.float32) + fb1              # (batch, 128)
    o_ref[...] = jnp.maximum(out, 0.0)                                   # single lane-dense store
    # TODO(synk): nn.Dropout(p) is identity in eval mode; train-mode RNG masking
    # is intentionally not implemented.


def _build_fused_call(batch):
    c0 = INPUT_SIZE[0]
    c1, c2 = CONV_CHANNELS
    hid = ENC_FULL_LAYERS[0]
    w1_cols = batch * GRID + (KH - 1) * W + (KW - 1)
    x_cols = batch * GRID + 128          # zero-padded input columns (>= w1_cols + 34)

    kernel = functools.partial(_encoder_kernel, batch=batch)
    return pl.pallas_call(
        kernel,
        out_shape=jax.ShapeDtypeStruct((batch, OUT_PAD), jnp.float32),
        grid=(1,),
        in_specs=[
            pl.BlockSpec((c0, x_cols), lambda i: (0, 0)),               # x (channel-major, bf16)
            pl.BlockSpec((WSLAB_ROWS, 128), lambda i: (0, 0)),          # coalesced bf16 weights
            pl.BlockSpec((BSLAB_ROWS, 128), lambda i: (0, 0)),          # coalesced f32 biases
            pl.BlockSpec((c2 * GRID, hid), lambda i: (0, 0)),           # fc0 grid-scattered weight
        ],
        out_specs=pl.BlockSpec((batch, OUT_PAD), lambda i: (0, 0)),
        scratch_shapes=[pltpu.VMEM((c1, w1_cols), jnp.bfloat16),        # conv0 output (bf16)
                        pltpu.VMEM((batch, c2 * GRID), jnp.bfloat16)],  # flattened fc0 input
        compiler_params=pltpu.CompilerParams(
            dimension_semantics=("arbitrary",)),
        # NOTE(v7x): single grid step -> one TensorCore; once batch per call grows,
        # add a leading "parallel" grid axis over image tiles (weight index_maps
        # constant) to shard across both TCs.  At batch=2 the kernel is fixed-
        # overhead bound and a second launch/core would not help.
    )


# ----------------------------------------------------------------------------
# Parameters: generated in PyTorch layouts, then packed ONCE into kernel layouts.
# ----------------------------------------------------------------------------
def init_params(key):
    """Torch-style parameters: Conv2d (O, C, kh, kw); Linear stored as (in, out)."""
    c_in, h, w = INPUT_SIZE
    params = {}
    k = key
    prev_c, ho, wo = c_in, h, w
    for i, out_c in enumerate(CONV_CHANNELS):
        k, kw_, kb_ = jax.random.split(k, 3)
        params[f'conv{i}_w'] = 0.05 * jax.random.normal(
            kw_, (out_c, prev_c, KH, KW), jnp.float32)
        params[f'conv{i}_b'] = 0.05 * jax.random.normal(kb_, (out_c,), jnp.float32)
        prev_c, ho, wo = out_c, ho - (KH - 1), wo - (KW - 1)
    last = prev_c * ho * wo                        # 16*12*12 = 2304
    for i, layer_size in enumerate(ENC_FULL_LAYERS + [OUTPUT_SIZE]):
        k, kw_, kb_ = jax.random.split(k, 3)
        params[f'fc{i}_w'] = 0.05 * jax.random.normal(kw_, (last, layer_size), jnp.float32)
        params[f'fc{i}_b'] = 0.05 * jax.random.normal(kb_, (layer_size,), jnp.float32)
        last = layer_size
    return params


def pack_params(params):
    """One-time repack: tap-stacked conv weights + fc1 weight into one bf16 slab,
    all biases into one f32 slab, fc0 weight scattered onto the full 16x16 grid."""
    c0 = INPUT_SIZE[0]
    c1, c2 = CONV_CHANNELS
    hid = ENC_FULL_LAYERS[0]
    ho2, wo2 = H - 2 * (KH - 1), W - 2 * (KW - 1)          # 12, 12 (after two 3x3 convs)

    # conv weights: (O, C, kh, kw) -> (O, kh*kw*C); column index = (di*KW+dj)*C + c,
    # matching the in-kernel tap-stacked activation rows.
    w0s = params['conv0_w'].transpose(0, 2, 3, 1).reshape(c1, KH * KW * c0)
    w1s = params['conv1_w'].transpose(0, 2, 3, 1).reshape(c2, KH * KW * c1)

    wslab = jnp.zeros((WSLAB_ROWS, 128), jnp.float32)
    wslab = wslab.at[W0_ROW:W0_ROW + c1, 0:KH * KW * c0].set(w0s)
    wslab = wslab.at[W1_ROW:W1_ROW + c2, 0:KH * KW * c1].set(w1s)
    wslab = wslab.at[FW1_ROW:FW1_ROW + hid, 0:OUTPUT_SIZE].set(params['fc1_w'])

    bslab = jnp.zeros((BSLAB_ROWS, 128), jnp.float32)
    bslab = bslab.at[B0_ROW:B0_ROW + c1, 0].set(params['conv0_b'])
    bslab = bslab.at[B1_ROW:B1_ROW + c2, 0].set(params['conv1_b'])
    bslab = bslab.at[FB0_ROW, 0:hid].set(params['fc0_b'])
    bslab = bslab.at[FB1_ROW, 0:OUTPUT_SIZE].set(params['fc1_b'])

    # fc0: torch flatten order of the conv output is (c, i, j) over the 12x12 valid
    # region; scatter onto the full 16x16 grid (zero rows at invalid border / wrapped
    # positions) so the kernel contracts directly against grid-resident columns.
    fw0 = params['fc0_w'].reshape(c2, ho2, wo2, hid)                    # (16, 12, 12, 32)
    grid_w = jnp.zeros((c2, H, W, hid), jnp.float32).at[:, :ho2, :wo2, :].set(fw0)

    return {'wslab': wslab.astype(jnp.bfloat16),
            'bslab': bslab,                                             # biases stay f32
            'fw0': grid_w.reshape(c2 * GRID, hid).astype(jnp.bfloat16)}  # (4096, 32)


def encoder_forward(packed, images):
    # torch forward: `images.view(N,C,H,W)` is computed then discarded; the conv stack
    # is applied to `images` directly — identical here (images are already NCHW).
    n, c, h, w = images.shape
    # Channel-major flat-grid activation layout (C, N*H*W), zero-padded on the lane dim
    # so all in-kernel shifted conv reads stay in bounds; cast to bf16 ONCE here.
    x2d = images.transpose(1, 0, 2, 3).reshape(c, n * h * w)
    x2d = jnp.pad(x2d, ((0, 0), (0, 128))).astype(jnp.bfloat16)
    out = _build_fused_call(n)(x2d, packed['wslab'], packed['bslab'], packed['fw0'])
    return out[:, :OUTPUT_SIZE]


# ----------------------------------------------------------------------------
# Pure-JAX reference (f32) for correctness checking.
# ----------------------------------------------------------------------------
def encoder_reference(params, images):
    x = images
    for i in range(len(CONV_CHANNELS)):
        x = jax.lax.conv_general_dilated(
            x, params[f'conv{i}_w'], (1, 1), 'VALID',
            dimension_numbers=('NCHW', 'OIHW', 'NCHW'))
        x = jnp.maximum(x + params[f'conv{i}_b'][None, :, None, None], 0.0)
    v = x.reshape(x.shape[0], -1)
    for i in range(len(ENC_FULL_LAYERS) + 1):
        v = jnp.maximum(v @ params[f'fc{i}_w'] + params[f'fc{i}_b'], 0.0)
    return v


if __name__ == "__main__":
    key = jax.random.PRNGKey(0)
    pkey, xkey = jax.random.split(key)
    params = init_params(pkey)
    packed = pack_params(params)          # one-time weight repack (host side)

    batch = 2
    images = jax.random.normal(xkey, (batch,) + INPUT_SIZE, jnp.float32)  # (2, 4, 16, 16)

    out = jax.jit(encoder_forward)(packed, images)
    out = jax.block_until_ready(out)
    assert out.shape == (batch, OUTPUT_SIZE), out.shape
    assert bool(jnp.all(jnp.isfinite(out)))

    ref = encoder_reference(params, images)
    max_err = float(jnp.max(jnp.abs(out - ref)))
    assert max_err < 5e-2, f"max abs err vs f32 reference: {max_err}"   # bf16 operands

    print("KERNEL_OK")
</pallas_src>

<mosaic_0001>
module attributes {stable_mosaic.version = 11 : i64} {
  func.func @_encoder_kernel(%arg0: i32, %arg1: memref<4x640xbf16, #tpu.memory_space<vmem>>, %arg2: memref<64x128xbf16, #tpu.memory_space<vmem>>, %arg3: memref<40x128xf32, #tpu.memory_space<vmem>>, %arg4: memref<4096x32xbf16, #tpu.memory_space<vmem>>, %arg5: memref<2x128xf32, #tpu.memory_space<vmem>>, %arg6: memref<8x546xbf16, #tpu.memory_space<vmem>>, %arg7: memref<2x4096xbf16, #tpu.memory_space<vmem>>) attributes {dimension_semantics = [#tpu.dimension_semantics<arbitrary>], iteration_bounds = array<i64: 1>, scalar_prefetch = 0 : i64, scratch_operands = 2 : i64, tpu.core_type = #tpu.core_type<tc>, window_params = [{pipeline_mode = #tpu.pipeline_mode<synchronous>, transform_indices = @transform_0, window_bounds = array<i64: 4, 640>}, {pipeline_mode = #tpu.pipeline_mode<synchronous>, transform_indices = @transform_1, window_bounds = array<i64: 64, 128>}, {pipeline_mode = #tpu.pipeline_mode<synchronous>, transform_indices = @transform_2, window_bounds = array<i64: 40, 128>}, {pipeline_mode = #tpu.pipeline_mode<synchronous>, transform_indices = @transform_3, window_bounds = array<i64: 4096, 32>}, {pipeline_mode = #tpu.pipeline_mode<synchronous>, transform_indices = @transform_4, window_bounds = array<i64: 2, 128>}]} {
    %c0 = arith.constant 0 : index
    %c0_0 = arith.constant 0 : index
    %0 = vector.load %arg2[%c0, %c0_0] : memref<64x128xbf16, #tpu.memory_space<vmem>>, vector<8x36xbf16>
    %c16 = arith.constant 16 : index
    %c0_1 = arith.constant 0 : index
    %1 = vector.load %arg2[%c16, %c0_1] : memref<64x128xbf16, #tpu.memory_space<vmem>>, vector<16x72xbf16>
    %c32 = arith.constant 32 : index
    %c0_2 = arith.constant 0 : index
    %2 = vector.load %arg2[%c32, %c0_2] : memref<64x128xbf16, #tpu.memory_space<vmem>>, vector<32x128xbf16>
    %c0_3 = arith.constant 0 : index
    %c0_4 = arith.constant 0 : index
    %3 = vector.load %arg3[%c0_3, %c0_4] : memref<40x128xf32, #tpu.memory_space<vmem>>, vector<8x1xf32>
    %c8 = arith.constant 8 : index
    %c0_5 = arith.constant 0 : index
    %4 = vector.load %arg3[%c8, %c0_5] : memref<40x128xf32, #tpu.memory_space<vmem>>, vector<16x1xf32>
    %c24 = arith.constant 24 : index
    %c0_6 = arith.constant 0 : index
    %5 = vector.load %arg3[%c24, %c0_6] : memref<40x128xf32, #tpu.memory_space<vmem>>, vector<1x32xf32>
    %c32_7 = arith.constant 32 : index
    %c0_8 = arith.constant 0 : index
    %6 = vector.load %arg3[%c32_7, %c0_8] : memref<40x128xf32, #tpu.memory_space<vmem>>, vector<1x128xf32>
    %c0_9 = arith.constant 0 : index
    %c0_10 = arith.constant 0 : index
    %7 = vector.load %arg1[%c0_9, %c0_10] : memref<4x640xbf16, #tpu.memory_space<vmem>>, vector<4x546xbf16>
    %c0_11 = arith.constant 0 : index
    %c1 = arith.constant 1 : index
    %8 = vector.load %arg1[%c0_11, %c1] : memref<4x640xbf16, #tpu.memory_space<vmem>>, vector<4x546xbf16>
    %c0_12 = arith.constant 0 : index
    %c2 = arith.constant 2 : index
    %9 = vector.load %arg1[%c0_12, %c2] : memref<4x640xbf16, #tpu.memory_space<vmem>>, vector<4x546xbf16>
    %c0_13 = arith.constant 0 : index
    %c16_14 = arith.constant 16 : index
    %10 = vector.load %arg1[%c0_13, %c16_14] : memref<4x640xbf16, #tpu.memory_space<vmem>>, vector<4x546xbf16>
    %c0_15 = arith.constant 0 : index
    %c17 = arith.constant 17 : index
    %11 = vector.load %arg1[%c0_15, %c17] : memref<4x640xbf16, #tpu.memory_space<vmem>>, vector<4x546xbf16>
    %c0_16 = arith.constant 0 : index
    %c18 = arith.constant 18 : index
    %12 = vector.load %arg1[%c0_16, %c18] : memref<4x640xbf16, #tpu.memory_space<vmem>>, vector<4x546xbf16>
    %c0_17 = arith.constant 0 : index
    %c32_18 = arith.constant 32 : index
    %13 = vector.load %arg1[%c0_17, %c32_18] : memref<4x640xbf16, #tpu.memory_space<vmem>>, vector<4x546xbf16>
    %c0_19 = arith.constant 0 : index
    %c33 = arith.constant 33 : index
    %14 = vector.load %arg1[%c0_19, %c33] : memref<4x640xbf16, #tpu.memory_space<vmem>>, vector<4x546xbf16>
    %c0_20 = arith.constant 0 : index
    %c34 = arith.constant 34 : index
    %15 = vector.load %arg1[%c0_20, %c34] : memref<4x640xbf16, #tpu.memory_space<vmem>>, vector<4x546xbf16>
    %16 = tpu.concatenate %7, %8, %9, %10, %11, %12, %13, %14, %15 in 0 : vector<4x546xbf16>, vector<4x546xbf16>, vector<4x546xbf16>, vector<4x546xbf16>, vector<4x546xbf16>, vector<4x546xbf16>, vector<4x546xbf16>, vector<4x546xbf16>, vector<4x546xbf16> -> vector<36x546xbf16>
    %cst = arith.constant dense<0.000000e+00> : vector<8x546xf32>
    %17 = tpu.matmul %0, %16, %cst {dimension_numbers = #tpu.dot_dimension_numbers<[1], [0], [0], [1], [0, 0, 1, 1], [], []>} : vector<8x36xbf16>, vector<36x546xbf16>, vector<8x546xf32> -> vector<8x546xf32>
    %18 = vector.broadcast %3 : vector<8x1xf32> to vector<8x546xf32>
    %19 = arith.addf %17, %18 : vector<8x546xf32>
    %cst_21 = arith.constant 0.000000e+00 : f32
    %20 = vector.broadcast %cst_21 : f32 to vector<8x546xf32>
    %21 = arith.maximumf %19, %20 : vector<8x546xf32>
    %22 = arith.truncf %21 : vector<8x546xf32> to vector<8x546xbf16>
    %c0_22 = arith.constant 0 : index
    %c0_23 = arith.constant 0 : index
    %23 = vector.load %arg6[%c0_22, %c0_23] : memref<8x546xbf16, #tpu.memory_space<vmem>>, vector<8x546xbf16>
    tpu.vector_store %arg6[%c0_22, %c0_23], %22 {strides = array<i32>} : memref<8x546xbf16, #tpu.memory_space<vmem>>, vector<8x546xbf16>,
    %c0_24 = arith.constant 0 : index
    %c0_25 = arith.constant 0 : index
    %24 = vector.load %arg6[%c0_24, %c0_25] : memref<8x546xbf16, #tpu.memory_space<vmem>>, vector<8x512xbf16>
    %c0_26 = arith.constant 0 : index
    %c1_27 = arith.constant 1 : index
    %25 = vector.load %arg6[%c0_26, %c1_27] : memref<8x546xbf16, #tpu.memory_space<vmem>>, vector<8x512xbf16>
    %c0_28 = arith.constant 0 : index
    %c2_29 = arith.constant 2 : index
    %26 = vector.load %arg6[%c0_28, %c2_29] : memref<8x546xbf16, #tpu.memory_space<vmem>>, vector<8x512xbf16>
    %c0_30 = arith.constant 0 : index
    %c16_31 = arith.constant 16 : index
    %27 = vector.load %arg6[%c0_30, %c16_31] : memref<8x546xbf16, #tpu.memory_space<vmem>>, vector<8x512xbf16>
    %c0_32 = arith.constant 0 : index
    %c17_33 = arith.constant 17 : index
    %28 = vector.load %arg6[%c0_32, %c17_33] : memref<8x546xbf16, #tpu.memory_space<vmem>>, vector<8x512xbf16>
    %c0_34 = arith.constant 0 : index
    %c18_35 = arith.constant 18 : index
    %29 = vector.load %arg6[%c0_34, %c18_35] : memref<8x546xbf16, #tpu.memory_space<vmem>>, vector<8x512xbf16>
    %c0_36 = arith.constant 0 : index
    %c32_37 = arith.constant 32 : index
    %30 = vector.load %arg6[%c0_36, %c32_37] : memref<8x546xbf16, #tpu.memory_space<vmem>>, vector<8x512xbf16>
    %c0_38 = arith.constant 0 : index
    %c33_39 = arith.constant 33 : index
    %31 = vector.load %arg6[%c0_38, %c33_39] : memref<8x546xbf16, #tpu.memory_space<vmem>>, vector<8x512xbf16>
    %c0_40 = arith.constant 0 : index
    %c34_41 = arith.constant 34 : index
    %32 = vector.load %arg6[%c0_40, %c34_41] : memref<8x546xbf16, #tpu.memory_space<vmem>>, vector<8x512xbf16>
    %33 = tpu.concatenate %24, %25, %26, %27, %28, %29, %30, %31, %32 in 0 : vector<8x512xbf16>, vector<8x512xbf16>, vector<8x512xbf16>, vector<8x512xbf16>, vector<8x512xbf16>, vector<8x512xbf16>, vector<8x512xbf16>, vector<8x512xbf16>, vector<8x512xbf16> -> vector<72x512xbf16>
    %cst_42 = arith.constant dense<0.000000e+00> : vector<16x512xf32>
    %34 = tpu.matmul %1, %33, %cst_42 {dimension_numbers = #tpu.dot_dimension_numbers<[1], [0], [0], [1], [0, 0, 1, 1], [], []>} : vector<16x72xbf16>, vector<72x512xbf16>, vector<16x512xf32> -> vector<16x512xf32>
    %35 = vector.broadcast %4 : vector<16x1xf32> to vector<16x512xf32>
    %36 = arith.addf %34, %35 : vector<16x512xf32>
    %cst_43 = arith.constant 0.000000e+00 : f32
    %37 = vector.broadcast %cst_43 : f32 to vector<16x512xf32>
    %38 = arith.maximumf %36, %37 : vector<16x512xf32>
    %39 = arith.truncf %38 : vector<16x512xf32> to vector<16x512xbf16>
    %40 = vector.extract_strided_slice %39 {offsets = [0, 0], sizes = [1, 256], strides = [1, 1]} : vector<16x512xbf16> to vector<1x256xbf16>
    %c0_44 = arith.constant 0 : index
    %c0_45 = arith.constant 0 : index
    %41 = vector.load %arg7[%c0_44, %c0_45] : memref<2x4096xbf16, #tpu.memory_space<vmem>>, vector<1x256xbf16>
    tpu.vector_store %arg7[%c0_44, %c0_45], %40 {strides = array<i32>} : memref<2x4096xbf16, #tpu.memory_space<vmem>>, vector<1x256xbf16>,
    %42 = vector.extract_strided_slice %39 {offsets = [1, 0], sizes = [1, 256], strides = [1, 1]} : vector<16x512xbf16> to vector<1x256xbf16>
    %c0_46 = arith.constant 0 : index
    %c256 = arith.constant 256 : index
    %43 = vector.load %arg7[%c0_46, %c256] : memref<2x4096xbf16, #tpu.memory_space<vmem>>, vector<1x256xbf16>
    tpu.vector_store %arg7[%c0_46, %c256], %42 {strides = array<i32>} : memref<2x4096xbf16, #tpu.memory_space<vmem>>, vector<1x256xbf16>,
    %44 = vector.extract_strided_slice %39 {offsets = [2, 0], sizes = [1, 256], strides = [1, 1]} : vector<16x512xbf16> to vector<1x256xbf16>
    %c0_47 = arith.constant 0 : index
    %c512 = arith.constant 512 : index
    %45 = vector.load %arg7[%c0_47, %c512] : memref<2x4096xbf16, #tpu.memory_space<vmem>>, vector<1x256xbf16>
    tpu.vector_store %arg7[%c0_47, %c512], %44 {strides = array<i32>} : memref<2x4096xbf16, #tpu.memory_space<vmem>>, vector<1x256xbf16>,
    %46 = vector.extract_strided_slice %39 {offsets = [3, 0], sizes = [1, 256], strides = [1, 1]} : vector<16x512xbf16> to vector<1x256xbf16>
    %c0_48 = arith.constant 0 : index
    %c768 = arith.constant 768 : index
    %47 = vector.load %arg7[%c0_48, %c768] : memref<2x4096xbf16, #tpu.memory_space<vmem>>, vector<1x256xbf16>
    tpu.vector_store %arg7[%c0_48, %c768], %46 {strides = array<i32>} : memref<2x4096xbf16, #tpu.memory_space<vmem>>, vector<1x256xbf16>,
    %48 = vector.extract_strided_slice %39 {offsets = [4, 0], sizes = [1, 256], strides = [1, 1]} : vector<16x512xbf16> to vector<1x256xbf16>
    %c0_49 = arith.constant 0 : index
    %c1024 = arith.constant 1024 : index
    %49 = vector.load %arg7[%c0_49, %c1024] : memref<2x4096xbf16, #tpu.memory_space<vmem>>, vector<1x256xbf16>
    tpu.vector_store %arg7[%c0_49, %c1024], %48 {strides = array<i32>} : memref<2x4096xbf16, #tpu.memory_space<vmem>>, vector<1x256xbf16>,
    %50 = vector.extract_strided_slice %39 {offsets = [5, 0], sizes = [1, 256], strides = [1, 1]} : vector<16x512xbf16> to vector<1x256xbf16>
    %c0_50 = arith.constant 0 : index
    %c1280 = arith.constant 1280 : index
    %51 = vector.load %arg7[%c0_50, %c1280] : memref<2x4096xbf16, #tpu.memory_space<vmem>>, vector<1x256xbf16>
    tpu.vector_store %arg7[%c0_50, %c1280], %50 {strides = array<i32>} : memref<2x4096xbf16, #tpu.memory_space<vmem>>, vector<1x256xbf16>,
    %52 = vector.extract_strided_slice %39 {offsets = [6, 0], sizes = [1, 256], strides = [1, 1]} : vector<16x512xbf16> to vector<1x256xbf16>
    %c0_51 = arith.constant 0 : index
    %c1536 = arith.constant 1536 : index
    %53 = vector.load %arg7[%c0_51, %c1536] : memref<2x4096xbf16, #tpu.memory_space<vmem>>, vector<1x256xbf16>
    tpu.vector_store %arg7[%c0_51, %c1536], %52 {strides = array<i32>} : memref<2x4096xbf16, #tpu.memory_space<vmem>>, vector<1x256xbf16>,
    %54 = vector.extract_strided_slice %39 {offsets = [7, 0], sizes = [1, 256], strides = [1, 1]} : vector<16x512xbf16> to vector<1x256xbf16>
    %c0_52 = arith.constant 0 : index
    %c1792 = arith.constant 1792 : index
    %55 = vector.load %arg7[%c0_52, %c1792] : memref<2x4096xbf16, #tpu.memory_space<vmem>>, vector<1x256xbf16>
    tpu.vector_store %arg7[%c0_52, %c1792], %54 {strides = array<i32>} : memref<2x4096xbf16, #tpu.memory_space<vmem>>, vector<1x256xbf16>,
    %56 = vector.extract_strided_slice %39 {offsets = [8, 0], sizes = [1, 256], strides = [1, 1]} : vector<16x512xbf16> to vector<1x256xbf16>
    %c0_53 = arith.constant 0 : index
    %c2048 = arith.constant 2048 : index
    %57 = vector.load %arg7[%c0_53, %c2048] : memref<2x4096xbf16, #tpu.memory_space<vmem>>, vector<1x256xbf16>
    tpu.vector_store %arg7[%c0_53, %c2048], %56 {strides = array<i32>} : memref<2x4096xbf16, #tpu.memory_space<vmem>>, vector<1x256xbf16>,
    %58 = vector.extract_strided_slice %39 {offsets = [9, 0], sizes = [1, 256], strides = [1, 1]} : vector<16x512xbf16> to vector<1x256xbf16>
    %c0_54 = arith.constant 0 : index
    %c2304 = arith.constant 2304 : index
    %59 = vector.load %arg7[%c0_54, %c2304] : memref<2x4096xbf16, #tpu.memory_space<vmem>>, vector<1x256xbf16>
    tpu.vector_store %arg7[%c0_54, %c2304], %58 {strides = array<i32>} : memref<2x4096xbf16, #tpu.memory_space<vmem>>, vector<1x256xbf16>,
    %60 = vector.extract_strided_slice %39 {offsets = [10, 0], sizes = [1, 256], strides = [1, 1]} : vector<16x512xbf16> to vector<1x256xbf16>
    %c0_55 = arith.constant 0 : index
    %c2560 = arith.constant 2560 : index
    %61 = vector.load %arg7[%c0_55, %c2560] : memref<2x4096xbf16, #tpu.memory_space<vmem>>, vector<1x256xbf16>
    tpu.vector_store %arg7[%c0_55, %c2560], %60 {strides = array<i32>} : memref<2x4096xbf16, #tpu.memory_space<vmem>>, vector<1x256xbf16>,
    %62 = vector.extract_strided_slice %39 {offsets = [11, 0], sizes = [1, 256], strides = [1, 1]} : vector<16x512xbf16> to vector<1x256xbf16>
    %c0_56 = arith.constant 0 : index
    %c2816 = arith.constant 2816 : index
    %63 = vector.load %arg7[%c0_56, %c2816] : memref<2x4096xbf16, #tpu.memory_space<vmem>>, vector<1x256xbf16>
    tpu.vector_store %arg7[%c0_56, %c2816], %62 {strides = array<i32>} : memref<2x4096xbf16, #tpu.memory_space<vmem>>, vector<1x256xbf16>,
    %64 = vector.extract_strided_slice %39 {offsets = [12, 0], sizes = [1, 256], strides = [1, 1]} : vector<16x512xbf16> to vector<1x256xbf16>
    %c0_57 = arith.constant 0 : index
    %c3072 = arith.constant 3072 : index
    %65 = vector.load %arg7[%c0_57, %c3072] : memref<2x4096xbf16, #tpu.memory_space<vmem>>, vector<1x256xbf16>
    tpu.vector_store %arg7[%c0_57, %c3072], %64 {strides = array<i32>} : memref<2x4096xbf16, #tpu.memory_space<vmem>>, vector<1x256xbf16>,
    %66 = vector.extract_strided_slice %39 {offsets = [13, 0], sizes = [1, 256], strides = [1, 1]} : vector<16x512xbf16> to vector<1x256xbf16>
    %c0_58 = arith.constant 0 : index
    %c3328 = arith.constant 3328 : index
    %67 = vector.load %arg7[%c0_58, %c3328] : memref<2x4096xbf16, #tpu.memory_space<vmem>>, vector<1x256xbf16>
    tpu.vector_store %arg7[%c0_58, %c3328], %66 {strides = array<i32>} : memref<2x4096xbf16, #tpu.memory_space<vmem>>, vector<1x256xbf16>,
    %68 = vector.extract_strided_slice %39 {offsets = [14, 0], sizes = [1, 256], strides = [1, 1]} : vector<16x512xbf16> to vector<1x256xbf16>
    %c0_59 = arith.constant 0 : index
    %c3584 = arith.constant 3584 : index
    %69 = vector.load %arg7[%c0_59, %c3584] : memref<2x4096xbf16, #tpu.memory_space<vmem>>, vector<1x256xbf16>
    tpu.vector_store %arg7[%c0_59, %c3584], %68 {strides = array<i32>} : memref<2x4096xbf16, #tpu.memory_space<vmem>>, vector<1x256xbf16>,
    %70 = vector.extract_strided_slice %39 {offsets = [15, 0], sizes = [1, 256], strides = [1, 1]} : vector<16x512xbf16> to vector<1x256xbf16>
    %c0_60 = arith.constant 0 : index
    %c3840 = arith.constant 3840 : index
    %71 = vector.load %arg7[%c0_60, %c3840] : memref<2x4096xbf16, #tpu.memory_space<vmem>>, vector<1x256xbf16>
    tpu.vector_store %arg7[%c0_60, %c3840], %70 {strides = array<i32>} : memref<2x4096xbf16, #tpu.memory_space<vmem>>, vector<1x256xbf16>,
    %72 = vector.extract_strided_slice %39 {offsets = [0, 256], sizes = [1, 256], strides = [1, 1]} : vector<16x512xbf16> to vector<1x256xbf16>
    %c1_61 = arith.constant 1 : index
    %c0_62 = arith.constant 0 : index
    %73 = vector.load %arg7[%c1_61, %c0_62] : memref<2x4096xbf16, #tpu.memory_space<vmem>>, vector<1x256xbf16>
    tpu.vector_store %arg7[%c1_61, %c0_62], %72 {strides = array<i32>} : memref<2x4096xbf16, #tpu.memory_space<vmem>>, vector<1x256xbf16>,
    %74 = vector.extract_strided_slice %39 {offsets = [1, 256], sizes = [1, 256], strides = [1, 1]} : vector<16x512xbf16> to vector<1x256xbf16>
    %c1_63 = arith.constant 1 : index
    %c256_64 = arith.constant 256 : index
    %75 = vector.load %arg7[%c1_63, %c256_64] : memref<2x4096xbf16, #tpu.memory_space<vmem>>, vector<1x256xbf16>
    tpu.vector_store %arg7[%c1_63, %c256_64], %74 {strides = array<i32>} : memref<2x4096xbf16, #tpu.memory_space<vmem>>, vector<1x256xbf16>,
    %76 = vector.extract_strided_slice %39 {offsets = [2, 256], sizes = [1, 256], strides = [1, 1]} : vector<16x512xbf16> to vector<1x256xbf16>
    %c1_65 = arith.constant 1 : index
    %c512_66 = arith.constant 512 : index
    %77 = vector.load %arg7[%c1_65, %c512_66] : memref<2x4096xbf16, #tpu.memory_space<vmem>>, vector<1x256xbf16>
    tpu.vector_store %arg7[%c1_65, %c512_66], %76 {strides = array<i32>} : memref<2x4096xbf16, #tpu.memory_space<vmem>>, vector<1x256xbf16>,
    %78 = vector.extract_strided_slice %39 {offsets = [3, 256], sizes = [1, 256], strides = [1, 1]} : vector<16x512xbf16> to vector<1x256xbf16>
    %c1_67 = arith.constant 1 : index
    %c768_68 = arith.constant 768 : index
    %79 = vector.load %arg7[%c1_67, %c768_68] : memref<2x4096xbf16, #tpu.memory_space<vmem>>, vector<1x256xbf16>
    tpu.vector_store %arg7[%c1_67, %c768_68], %78 {strides = array<i32>} : memref<2x4096xbf16, #tpu.memory_space<vmem>>, vector<1x256xbf16>,
    %80 = vector.extract_strided_slice %39 {offsets = [4, 256], sizes = [1, 256], strides = [1, 1]} : vector<16x512xbf16> to vector<1x256xbf16>
    %c1_69 = arith.constant 1 : index
    %c1024_70 = arith.constant 1024 : index
    %81 = vector.load %arg7[%c1_69, %c1024_70] : memref<2x4096xbf16, #tpu.memory_space<vmem>>, vector<1x256xbf16>
    tpu.vector_store %arg7[%c1_69, %c1024_70], %80 {strides = array<i32>} : memref<2x4096xbf16, #tpu.memory_space<vmem>>, vector<1x256xbf16>,
    %82 = vector.extract_strided_slice %39 {offsets = [5, 256], sizes = [1, 256], strides = [1, 1]} : vector<16x512xbf16> to vector<1x256xbf16>
    %c1_71 = arith.constant 1 : index
    %c1280_72 = arith.constant 1280 : index
    %83 = vector.load %arg7[%c1_71, %c1280_72] : memref<2x4096xbf16, #tpu.memory_space<vmem>>, vector<1x256xbf16>
    tpu.vector_store %arg7[%c1_71, %c1280_72], %82 {strides = array<i32>} : memref<2x4096xbf16, #tpu.memory_space<vmem>>, vector<1x256xbf16>,
    %84 = vector.extract_strided_slice %39 {offsets = [6, 256], sizes = [1, 256], strides = [1, 1]} : vector<16x512xbf16> to vector<1x256xbf16>
    %c1_73 = arith.constant 1 : index
    %c1536_74 = arith.constant 1536 : index
    %85 = vector.load %arg7[%c1_73, %c1536_74] : memref<2x4096xbf16, #tpu.memory_space<vmem>>, vector<1x256xbf16>
    tpu.vector_store %arg7[%c1_73, %c1536_74], %84 {strides = array<i32>} : memref<2x4096xbf16, #tpu.memory_space<vmem>>, vector<1x256xbf16>,
    %86 = vector.extract_strided_slice %39 {offsets = [7, 256], sizes = [1, 256], strides = [1, 1]} : vector<16x512xbf16> to vector<1x256xbf16>
    %c1_75 = arith.constant 1 : index
    %c1792_76 = arith.constant 1792 : index
    %87 = vector.load %arg7[%c1_75, %c1792_76] : memref<2x4096xbf16, #tpu.memory_space<vmem>>, vector<1x256xbf16>
    tpu.vector_store %arg7[%c1_75, %c1792_76], %86 {strides = array<i32>} : memref<2x4096xbf16, #tpu.memory_space<vmem>>, vector<1x256xbf16>,
    %88 = vector.extract_strided_slice %39 {offsets = [8, 256], sizes = [1, 256], strides = [1, 1]} : vector<16x512xbf16> to vector<1x256xbf16>
    %c1_77 = arith.constant 1 : index
    %c2048_78 = arith.constant 2048 : index
    %89 = vector.load %arg7[%c1_77, %c2048_78] : memref<2x4096xbf16, #tpu.memory_space<vmem>>, vector<1x256xbf16>
    tpu.vector_store %arg7[%c1_77, %c2048_78], %88 {strides = array<i32>} : memref<2x4096xbf16, #tpu.memory_space<vmem>>, vector<1x256xbf16>,
    %90 = vector.extract_strided_slice %39 {offsets = [9, 256], sizes = [1, 256], strides = [1, 1]} : vector<16x512xbf16> to vector<1x256xbf16>
    %c1_79 = arith.constant 1 : index
    %c2304_80 = arith.constant 2304 : index
    %91 = vector.load %arg7[%c1_79, %c2304_80] : memref<2x4096xbf16, #tpu.memory_space<vmem>>, vector<1x256xbf16>
    tpu.vector_store %arg7[%c1_79, %c2304_80], %90 {strides = array<i32>} : memref<2x4096xbf16, #tpu.memory_space<vmem>>, vector<1x256xbf16>,
    %92 = vector.extract_strided_slice %39 {offsets = [10, 256], sizes = [1, 256], strides = [1, 1]} : vector<16x512xbf16> to vector<1x256xbf16>
    %c1_81 = arith.constant 1 : index
    %c2560_82 = arith.constant 2560 : index
    %93 = vector.load %arg7[%c1_81, %c2560_82] : memref<2x4096xbf16, #tpu.memory_space<vmem>>, vector<1x256xbf16>
    tpu.vector_store %arg7[%c1_81, %c2560_82], %92 {strides = array<i32>} : memref<2x4096xbf16, #tpu.memory_space<vmem>>, vector<1x256xbf16>,
    %94 = vector.extract_strided_slice %39 {offsets = [11, 256], sizes = [1, 256], strides = [1, 1]} : vector<16x512xbf16> to vector<1x256xbf16>
    %c1_83 = arith.constant 1 : index
    %c2816_84 = arith.constant 2816 : index
    %95 = vector.load %arg7[%c1_83, %c2816_84] : memref<2x4096xbf16, #tpu.memory_space<vmem>>, vector<1x256xbf16>
    tpu.vector_store %arg7[%c1_83, %c2816_84], %94 {strides = array<i32>} : memref<2x4096xbf16, #tpu.memory_space<vmem>>, vector<1x256xbf16>,
    %96 = vector.extract_strided_slice %39 {offsets = [12, 256], sizes = [1, 256], strides = [1, 1]} : vector<16x512xbf16> to vector<1x256xbf16>
    %c1_85 = arith.constant 1 : index
    %c3072_86 = arith.constant 3072 : index
    %97 = vector.load %arg7[%c1_85, %c3072_86] : memref<2x4096xbf16, #tpu.memory_space<vmem>>, vector<1x256xbf16>
    tpu.vector_store %arg7[%c1_85, %c3072_86], %96 {strides = array<i32>} : memref<2x4096xbf16, #tpu.memory_space<vmem>>, vector<1x256xbf16>,
    %98 = vector.extract_strided_slice %39 {offsets = [13, 256], sizes = [1, 256], strides = [1, 1]} : vector<16x512xbf16> to vector<1x256xbf16>
    %c1_87 = arith.constant 1 : index
    %c3328_88 = arith.constant 3328 : index
    %99 = vector.load %arg7[%c1_87, %c3328_88] : memref<2x4096xbf16, #tpu.memory_space<vmem>>, vector<1x256xbf16>
    tpu.vector_store %arg7[%c1_87, %c3328_88], %98 {strides = array<i32>} : memref<2x4096xbf16, #tpu.memory_space<vmem>>, vector<1x256xbf16>,
    %100 = vector.extract_strided_slice %39 {offsets = [14, 256], sizes = [1, 256], strides = [1, 1]} : vector<16x512xbf16> to vector<1x256xbf16>
    %c1_89 = arith.constant 1 : index
    %c3584_90 = arith.constant 3584 : index
    %101 = vector.load %arg7[%c1_89, %c3584_90] : memref<2x4096xbf16, #tpu.memory_space<vmem>>, vector<1x256xbf16>
    tpu.vector_store %arg7[%c1_89, %c3584_90], %100 {strides = array<i32>} : memref<2x4096xbf16, #tpu.memory_space<vmem>>, vector<1x256xbf16>,
    %102 = vector.extract_strided_slice %39 {offsets = [15, 256], sizes = [1, 256], strides = [1, 1]} : vector<16x512xbf16> to vector<1x256xbf16>
    %c1_91 = arith.constant 1 : index
    %c3840_92 = arith.constant 3840 : index
    %103 = vector.load %arg7[%c1_91, %c3840_92] : memref<2x4096xbf16, #tpu.memory_space<vmem>>, vector<1x256xbf16>
    tpu.vector_store %arg7[%c1_91, %c3840_92], %102 {strides = array<i32>} : memref<2x4096xbf16, #tpu.memory_space<vmem>>, vector<1x256xbf16>,
    %c0_93 = arith.constant 0 : index
    %c0_94 = arith.constant 0 : index
    %104 = vector.load %arg7[%c0_93, %c0_94] : memref<2x4096xbf16, #tpu.memory_space<vmem>>, vector<2x4096xbf16>
    %c0_95 = arith.constant 0 : index
    %c0_96 = arith.constant 0 : index
    %105 = vector.load %arg4[%c0_95, %c0_96] : memref<4096x32xbf16, #tpu.memory_space<vmem>>, vector<4096x32xbf16>
    %cst_97 = arith.constant dense<0.000000e+00> : vector<2x32xf32>
    %106 = tpu.matmul %104, %105, %cst_97 {dimension_numbers = #tpu.dot_dimension_numbers<[1], [0], [0], [1], [0, 0, 1, 1], [], []>} : vector<2x4096xbf16>, vector<4096x32xbf16>, vector<2x32xf32> -> vector<2x32xf32>
    %107 = vector.broadcast %5 : vector<1x32xf32> to vector<2x32xf32>
    %108 = arith.addf %106, %107 : vector<2x32xf32>
    %cst_98 = arith.constant 0.000000e+00 : f32
    %109 = vector.broadcast %cst_98 : f32 to vector<2x32xf32>
    %110 = arith.maximumf %108, %109 : vector<2x32xf32>
    %111 = arith.truncf %110 : vector<2x32xf32> to vector<2x32xbf16>
    %cst_99 = arith.constant dense<0.000000e+00> : vector<2x128xf32>
    %112 = tpu.matmul %111, %2, %cst_99 {dimension_numbers = #tpu.dot_dimension_numbers<[1], [0], [0], [1], [0, 0, 1, 1], [], []>} : vector<2x32xbf16>, vector<32x128xbf16>, vector<2x128xf32> -> vector<2x128xf32>
    %113 = vector.broadcast %6 : vector<1x128xf32> to vector<2x128xf32>
    %114 = arith.addf %112, %113 : vector<2x128xf32>
    %cst_100 = arith.constant 0.000000e+00 : f32
    %115 = vector.broadcast %cst_100 : f32 to vector<2x128xf32>
    %116 = arith.maximumf %114, %115 : vector<2x128xf32>
    %c0_101 = arith.constant 0 : index
    %c0_102 = arith.constant 0 : index
    %117 = vector.load %arg5[%c0_101, %c0_102] : memref<2x128xf32, #tpu.memory_space<vmem>>, vector<2x128xf32>
    tpu.vector_store %arg5[%c0_101, %c0_102], %116 {strides = array<i32>} : memref<2x128xf32, #tpu.memory_space<vmem>>, vector<2x128xf32>,
    return
  }
  func.func @transform_0(%arg0: i32) -> (i32, i32) {
    %c0_i32 = arith.constant 0 : i32
    %c0_i32_0 = arith.constant 0 : i32
    %c0_i32_1 = arith.constant 0 : i32
    return %c0_i32, %c0_i32_0 : i32, i32
  }
  func.func @transform_1(%arg0: i32) -> (i32, i32) {
    %c0_i32 = arith.constant 0 : i32
    %c0_i32_0 = arith.constant 0 : i32
    %c0_i32_1 = arith.constant 0 : i32
    return %c0_i32, %c0_i32_0 : i32, i32
  }
  func.func @transform_2(%arg0: i32) -> (i32, i32) {
    %c0_i32 = arith.constant 0 : i32
    %c0_i32_0 = arith.constant 0 : i32
    %c0_i32_1 = arith.constant 0 : i32
    return %c0_i32, %c0_i32_0 : i32, i32
  }
  func.func @transform_3(%arg0: i32) -> (i32, i32) {
    %c0_i32 = arith.constant 0 : i32
    %c0_i32_0 = arith.constant 0 : i32
    %c0_i32_1 = arith.constant 0 : i32
    return %c0_i32, %c0_i32_0 : i32, i32
  }
  func.func @transform_4(%arg0: i32) -> (i32, i32) {
    %c0_i32 = arith.constant 0 : i32
    %c0_i32_0 = arith.constant 0 : i32
    %c0_i32_1 = arith.constant 0 : i32
    return %c0_i32, %c0_i32_0 : i32, i32
  }
}

</mosaic_0001>

<bundles_post_ra>
// kernel: encoder_forward.1
= control target key start
LH: loop header
LB: loop body
LE: loop exit
PB: predicated region body
PF: predicated region fallthrough
CT: control target
= control target key end

     0   :  { %v39_v1 = vlaneseq  ;;  %v5077_v2 = vmov 1983009808   ;;  %s5078_s19 = smov 127   ;;  %s5079_s20 = smov 126   ;;  %v5085_v24 = vmov 0   ;;  %vm86_vm0 = vcmask 1039360   ;;  %s6455_s0 = inlined_call_operand.vmem [shape: bf16[4,640], index: 0, kind: input, shape index: {}]   ;;  %s6456_s1 = inlined_call_operand.vmem [shape: bf16[64,128], index: 1, kind: input, shape index: {}]   ;;  %s6457_s2 = inlined_call_operand.vmem [shape: f32[40,128], index: 2, kind: input, shape index: {}]   ;;  %s6458_s3 = inlined_call_operand.vmem [shape: bf16[4096,32], index: 3, kind: input, shape index: {}]   ;;  %s6459_s4 = inlined_call_operand.hbm [shape: f32[2,128], index: 4, kind: output, shape index: {}]  }
   0x1   :  { %v31_v0 = vld [vmem:[%s6455_s0] sm:$0xff]  ;;  %v37_v3 = vunpack.c.l.s4 %v5077_v2  ;;  %v32_v11 = vld [vmem:[%s6455_s0 + $0x8] sm:$0x3]  ;;  %s5080_s0 = smov 112   ;;  %s5081_s21 = smov 111   ;;  %340 = vmatprep.mubr.bf16.mxu0 %v5085_v24  ;;  %381 = vmatprep.mubr.bf16.mxu1 %v5085_v24  ;;  %vm104_vm1 = vcmask 1031168  }
   0x2   :  { %v5119_v4 = vshrl.u32 %v39_v1, 7  ;;  %v59_v6 = vcombine.low %v31_v0, %v31_v0  ;;  %v35_v8 = vcombine.high %v31_v0, %v31_v0  ;;  %v68_v16 = vcombine.low %v32_v11, %v32_v11  ;;  %s5082_s22 = smov 110   ;;  %s5083_s23 = smov 96   ;;  %4780 = vset.pattern.permute.xlu0 %v5085_v24  ;;  %4781 = vset.pattern.permute.xlu1 %v5085_v24  ;;  %v26_v25 = vld [vmem:[%s6457_s2] sm:$0xff] }
   0x3   :  { %v38_v5 = vunpack.c.0.s8 %v37_v3  ;;  %s5084_s24 = smov 95   ;;  %s5086_s25 = smov 94   ;;  %vm201_vm2 = vcmask 1041408   ;;  %vm121_vm3 = vcmask 916480   ;;  %vm217_vm4 = vcmask 1043456  }
   0x4   :  { %vm228_vm5 = vcmask 1045504   ;;  %vm151_vm6 = vcmask 900096   ;;  %vm166_vm7 = vcmask 785408   ;;  %vm136_vm8 = vcmask 908288  }
   0x5   :  { %v41_v7 = vsub.s32 %v38_v5, %v5119_v4  ;;  %vm181_vm9 = vcmask 777216  }
   0x7   :  { %v66_v9 = vrot.slane %v59_v6, %v41_v7  ;;  %v5122_v10 = vrot.slane %v31_v0, %v41_v7  ;;  %v5128_v12 = vrot.slane %v35_v8, %v41_v7  ;;  %v75_v18 = vrot.slane %v68_v16, %v41_v7 }
   0x8   :  { %v5147_v19 = vrot.slane %v32_v11, %v41_v7 }
   0x9   :  { %76 = vrot.lane.b32.xlu1 %v66_v9, %s5078_s19  ;;  %80 = vrot.lane.b32.xlu0 %v5122_v10, %s5078_s19  ;;  %v67_v13 = vcombine.high %v66_v9, %v66_v9  ;;  %v5137_v14 = vcombine.high %v5122_v10, %v5122_v10  ;;  %v92_v15 = vcombine.low %v5128_v12, %v5128_v12 }
   0xa   :  { %v91_v17 = vcombine.low %v5122_v10, %v5122_v10  ;;  %v93_v20 = vcombine.low %v5147_v19, %v5147_v19  ;;  %v109_v21 = vcombine.low %v66_v9, %v66_v9  ;;  %v110_v22 = vcombine.low %v75_v18, %v75_v18 }
   0xb   :  { %v5175_v23 = vcombine.high %v5128_v12, %v5128_v12 }
   0xd   :  { %96 = vrot.lane.b32.xlu1 %v5122_v10, %s5079_s20  ;;  %78 = vrot.lane.b32.xlu0 %v67_v13, %s5078_s19 }
  0x11   :  { %82 = vrot.lane.b32.xlu1 %v5137_v14, %s5078_s19  ;;  %98 = vrot.lane.b32.xlu0 %v92_v15, %s5079_s20 }
  0x15   :  { %94 = vrot.lane.b32.xlu1 %v91_v17, %s5079_s20  ;;  %84 = vrot.lane.b32.xlu0 %v75_v18, %s5078_s19 }
  0x19   :  { %115 = vrot.lane.b32.xlu1 %v91_v17, %s5080_s0  ;;  %113 = vrot.lane.b32.xlu0 %v66_v9, %s5080_s0 }
  0x1d   :  { %102 = vrot.lane.b32.xlu1 %v93_v20, %s5079_s20  ;;  %100 = vrot.lane.b32.xlu0 %v5128_v12, %s5079_s20 }
  0x21   :  { %117 = vrot.lane.b32.xlu1 %v5122_v10, %s5080_s0  ;;  %111 = vrot.lane.b32.xlu0 %v109_v21, %s5080_s0 }
  0x25   :  { %128 = vrot.lane.b32.xlu1 %v5137_v14, %s5081_s21  ;;  %119 = vrot.lane.b32.xlu0 %v110_v22, %s5080_s0 }
  0x29   :  { %143 = vrot.lane.b32.xlu1 %v67_v13, %s5082_s22  ;;  %130 = vrot.lane.b32.xlu0 %v5128_v12, %s5081_s21 }
  0x2d   :  { %126 = vrot.lane.b32.xlu1 %v5122_v10, %s5081_s21  ;;  %145 = vrot.lane.b32.xlu0 %v5122_v10, %s5082_s22 }
  0x31   :  { %158 = vrot.lane.b32.xlu1 %v5122_v10, %s5083_s23  ;;  %141 = vrot.lane.b32.xlu0 %v66_v9, %s5082_s22 }
  0x35   :  { %160 = vrot.lane.b32.xlu0 %v92_v15, %s5083_s23  ;;  %132 = vrot.lane.b32.xlu1 %v5175_v23, %s5081_s21 }
  0x39   :  { %134 = vrot.lane.b32.xlu0 %v5147_v19, %s5081_s21  ;;  %147 = vrot.lane.b32.xlu1 %v5137_v14, %s5082_s22 }
  0x3d   :  { %149 = vrot.lane.b32.xlu0 %v75_v18, %s5082_s22  ;;  %156 = vrot.lane.b32.xlu1 %v91_v17, %s5083_s23 }
  0x41   :  { %173 = vrot.lane.b32.xlu0 %v66_v9, %s5084_s24  ;;  %175 = vrot.lane.b32.xlu1 %v91_v17, %s5084_s24 }
  0x45   :  { %162 = vrot.lane.b32.xlu0 %v5128_v12, %s5083_s23  ;;  %164 = vrot.lane.b32.xlu1 %v93_v20, %s5083_s23 }
  0x49   :  { %171 = vrot.lane.b32.xlu0 %v109_v21, %s5084_s24  ;;  %177 = vrot.lane.b32.xlu1 %v5122_v10, %s5084_s24 }
  0x4d   :  { %179 = vrot.lane.b32.xlu0 %v110_v22, %s5084_s24  ;;  %186 = vrot.lane.b32.xlu1 %v5122_v10, %s5086_s25 }
  0x51   :  { %188 = vrot.lane.b32.xlu0 %v5137_v14, %s5086_s25  ;;  %190 = vrot.lane.b32.xlu1 %v5128_v12, %s5086_s25 }
  0x55   :  { %192 = vrot.lane.b32.xlu0 %v5175_v23, %s5086_s25  ;;  %194 = vrot.lane.b32.xlu1 %v5147_v19, %s5086_s25 }
  0x59   :  { %286 = vperm.xlu0 %4780, %v26_v25  }
  0x7b   :  { %v77_v26 = vpop.permute.xlu1 %76  ;;  %v81_v27 = vpop.permute.xlu0 %80 }
  0x7f   :  { %v97_v28 = vpop.permute.xlu1 %96  ;;  %v79_v29 = vpop.permute.xlu0 %78 }
  0x80   :  { %v88_v34 = vsel %vm86_vm0, %v79_v29, %v81_v27  ;;  %v87_v44 = vsel %vm86_vm0, %v77_v26, %v79_v29 }
  0x81   :  { %v207_v36 = vsel %vm201_vm2, %v5137_v14, %v88_v34  ;;  %v204_v46 = vsel %vm201_vm2, %v5122_v10, %v87_v44 }
  0x83   :  { %v83_v30 = vpop.permute.xlu1 %82  ;;  %v99_v31 = vpop.permute.xlu0 %98 }
  0x84   :  { %v106_v35 = vsel %vm104_vm1, %v97_v28, %v99_v31  ;;  %v89_v52 = vsel %vm86_vm0, %v81_v27, %v83_v30 }
  0x85   :  { %v221_v40 = vsel %vm217_vm4, %v207_v36, %v106_v35  ;;  %v210_v60 = vsel %vm201_vm2, %v5128_v12, %v89_v52 }
  0x87   :  { %v95_v32 = vpop.permute.xlu1 %94  ;;  %v5212_v33 = vpop.permute.xlu0 %84 }
  0x88   :  { %v105_v45 = vsel %vm104_vm1, %v95_v32, %v97_v28  ;;  %v90_v49 = vsel %vm86_vm0, %v83_v30, %v5212_v33 }
  0x89   :  { %v219_v51 = vsel %vm217_vm4, %v204_v46, %v105_v45  ;;  %v213_v56 = vsel %vm201_vm2, %v5175_v23, %v90_v49 }
  0x8b   :  { %v116_v37 = vpop.permute.xlu1 %115  ;;  %v114_v38 = vpop.permute.xlu0 %113 }
  0x8c   :  { %v123_v39 = vsel %vm121_vm3, %v114_v38, %v116_v37 }
  0x8d   :  { %v233_v41 = vsel %vm228_vm5, %v221_v40, %v123_v39 }
  0x8e   :  { %308 = vmatprep.subr.bf16.mxu0 %v233_v41 }
  0x8f   :  { %v5221_v42 = vpop.permute.xlu1 %102  ;;  %v101_v43 = vpop.permute.xlu0 %100 }
  0x90   :  { %v108_v53 = vsel %vm104_vm1, %v101_v43, %v5221_v42  ;;  %v107_v55 = vsel %vm104_vm1, %v99_v31, %v101_v43 }
  0x91   :  { %v225_v62 = vsel %vm217_vm4, %v213_v56, %v108_v53  ;;  %v223_v0 = vsel %vm217_vm4, %v210_v60, %v107_v55 }
  0x93   :  { %v118_v47 = vpop.permute.xlu1 %117  ;;  %v112_v48 = vpop.permute.xlu0 %111 }
  0x94   :  { %v122_v50 = vsel %vm121_vm3, %v112_v48, %v114_v38  ;;  %v124_v57 = vsel %vm121_vm3, %v116_v37, %v118_v47 }
  0x95   :  { %v230_v54 = vsel %vm228_vm5, %v219_v51, %v122_v50  ;;  %v236_v1 = vsel %vm228_vm5, %v223_v0, %v124_v57 }
  0x96   :  { %309 = vmatpush1.bf16.msra.mxu0 %v230_v54 }
  0x97   :  { %v129_v58 = vpop.permute.xlu1 %128  ;;  %v5239_v59 = vpop.permute.xlu0 %119 }
  0x98   :  { %v125_v61 = vsel %vm121_vm3, %v118_v47, %v5239_v59 }
  0x99   :  { %v239_v63 = vsel %vm228_vm5, %v225_v62, %v125_v61 }
  0x9a   :  { %349 = vmatprep.subr.bf16.mxu1 %v239_v63 }
  0x9b   :  { %v144_v2 = vpop.permute.xlu1 %143  ;;  %v131_v3 = vpop.permute.xlu0 %130  ;;  %350 = vmatpush1.bf16.msra.mxu1 %v236_v1 }
  0x9c   :  { %v138_v17 = vsel %vm136_vm8, %v129_v58, %v131_v3 }
  0x9f   :  { %v127_v5 = vpop.permute.xlu1 %126  ;;  %v146_v6 = vpop.permute.xlu0 %145 }
  0xa0   :  { %v153_v15 = vsel %vm151_vm6, %v144_v2, %v146_v6  ;;  %v137_v30 = vsel %vm136_vm8, %v127_v5, %v129_v58 }
  0xa1   :  { %v249_v18 = vsel %vm201_vm2, %v138_v17, %v153_v15 }
  0xa3   :  { %v159_v7 = vpop.permute.xlu1 %158  ;;  %v142_v8 = vpop.permute.xlu0 %141 }
  0xa4   :  { %v152_v28 = vsel %vm151_vm6, %v142_v8, %v144_v2 }
  0xa7   :  { %v161_v9 = vpop.permute.xlu0 %160  ;;  %v133_v10 = vpop.permute.xlu1 %132 }
  0xa8   :  { %v168_v16 = vsel %vm166_vm7, %v159_v7, %v161_v9 }
  0xa9   :  { %v262_v23 = vsel %vm217_vm4, %v249_v18, %v168_v16 }
  0xab   :  { %v5249_v11 = vpop.permute.xlu0 %134  ;;  %v148_v12 = vpop.permute.xlu1 %147 }
  0xaf   :  { %v5251_v13 = vpop.permute.xlu0 %149  ;;  %v157_v14 = vpop.permute.xlu1 %156 }
  0xb0   :  { %v167_v29 = vsel %vm166_vm7, %v157_v14, %v159_v7 }
  0xb3   :  { %v174_v20 = vpop.permute.xlu0 %173  ;;  %v176_v21 = vpop.permute.xlu1 %175 }
  0xb4   :  { %v183_v22 = vsel %vm181_vm9, %v174_v20, %v176_v21 }
  0xb5   :  { %v273_v25 = vsel %vm228_vm5, %v262_v23, %v183_v22 }
  0xb6   :  { %310 = vmatprep.subr.bf16.mxu0 %v273_v25 }
  0xb7   :  { %v163_v26 = vpop.permute.xlu0 %162  ;;  %v165_v27 = vpop.permute.xlu1 %164 }
  0xb8   :  { %9 = vsyncpa [#allocation5], 0  ;;  %v246_v31 = vsel %vm201_vm2, %v137_v30, %v152_v28  ;;  %v155_v35 = vsel %vm151_vm6, %v148_v12, %v5251_v13  ;;  %v154_v38 = vsel %vm151_vm6, %v146_v6, %v148_v12  ;;  %v170_v39 = vsel %vm166_vm7, %v163_v26, %v165_v27  ;;  %v19_v61 = vld [vmem:[%s6456_s1] sm:$0xf]  ;;  %s5090_s15 = smov [#allocation4]  }
  0xb9   :  { %v260_v37 = vsel %vm217_vm4, %v246_v31, %v167_v29  ;;  %v140_v41 = vsel %vm136_vm8, %v133_v10, %v5249_v11  ;;  %v169_v43 = vsel %vm166_vm7, %v161_v9, %v163_v26  ;;  %v139_v44 = vsel %vm136_vm8, %v131_v3, %v133_v10  ;;  %s4087_s16 = sshll.u32 %s5090_s15, 4  ;;  %s4088_s16 = int_to_ptr.vmem [resolvable:$true] %s4087_s16 }
  0xba   :  { %v255_v45 = vsel %vm201_vm2, %v140_v41, %v155_v35  ;;  %v252_v49 = vsel %vm201_vm2, %v139_v44, %v154_v38  ;;  %vm196_vm10 = vcmask 769024   ;;  %vm289_vm11 = vcmask 293888   ;;  %s5053_s17 = scalar_lea.vmem %s4088_s16, 32  ;;  %p5058_p1 = scmp.lt.s32.totalorder %s4088_s16, %s4088_s16 }
  0xbb   :  { %v172_v32 = vpop.permute.xlu0 %171  ;;  %v178_v34 = vpop.permute.xlu1 %177  ;;  %v266_v51 = vsel %vm217_vm4, %v255_v45, %v170_v39  ;;  %v264_v53 = vsel %vm217_vm4, %v252_v49, %v169_v43  ;;  %v216_v62 = vsel %vm201_vm2, %v5147_v19, %v5212_v33  ;;  %v5087_v1 = vmov 0.0   ;;  %v27_v39 = vld [vmem:[%s6457_s2 + $0x8] sm:$0xff]  ;;  %p5054_p0 = scmp.ne.s32.totalorder %s4088_s16, %s5053_s17  ;;  %p5059_p2 = scmp.lt.s32.totalorder %s5053_s17, %s5053_s17 }
  0xbc   :  { %v182_v36 = vsel %vm181_vm9, %v172_v32, %v174_v20  ;;  %v184_v46 = vsel %vm181_vm9, %v176_v21, %v178_v34  ;;  %v227_v2 = vsel %vm217_vm4, %v216_v62, %v5221_v42  ;;  %v258_v33 = vsel %vm201_vm2, %v5249_v11, %v5251_v13 }
  0xbd   :  { %v270_v40 = vsel %vm228_vm5, %v260_v37, %v182_v36  ;;  %v276_v54 = vsel %vm228_vm5, %v264_v53, %v184_v46  ;;  %v242_v6 = vsel %vm228_vm5, %v227_v2, %v5239_v59  ;;  %vm5088_vm12 = vmmov 0   ;;  %p5060_p3 = por %p5059_p2, %p5058_p1 }
  0xbe   :  { %311 = vmatpush1.bf16.msra.mxu0 %v270_v40  ;;  %v268_v42 = vsel %vm217_vm4, %v258_v33, %v165_v27  ;;  %vm458_vm13 = vcmask 273408   ;;  %v28_v40 = vld [vmem:[%s6457_s2 + $0x10] sm:$0xff]  ;;  %vm667_vm14 = vcmask 588800   ;;  %vm799_vm15 = vcmask 1040384  }
  0xbf   :  { %v180_v47 = vpop.permute.xlu0 %179  ;;  %v187_v48 = vpop.permute.xlu1 %186  ;;  %p5061_p4 = pnand %p5060_p3, %p5054_p0 }
  0xc0   :  { %v185_v50 = vsel %vm181_vm9, %v178_v34, %v180_v47  ;;  %v282_v59 = vsel %vm228_vm5, %v268_v42, %v180_v47 }
  0xc1   :  { %v279_v52 = vsel %vm228_vm5, %v266_v51, %v185_v50 }
  0xc2   :  { %351 = vmatprep.subr.bf16.mxu1 %v279_v52 }
  0xc3   :  { %v189_v55 = vpop.permute.xlu0 %188  ;;  %v191_v56 = vpop.permute.xlu1 %190  ;;  %352 = vmatpush1.bf16.msra.mxu1 %v276_v54 }
  0xc4   :  { %v197_v57 = vsel %vm196_vm10, %v187_v48, %v189_v55  ;;  %v198_v58 = vsel %vm196_vm10, %v189_v55, %v191_v56 }
  0xc5   :  { %4095 = vmatprep.subr.msk.bf16.mxu0 %vm201_vm2, %v198_v58  ;;  %v294_v60 = vsel %vm201_vm2, %v197_v57, 0 }
  0xc6   :  { %313 = vmatpush1.bf16.msra.mxu0 %v294_v60 }
  0xc7   :  { %v193_v63 = vpop.permute.xlu0 %192  ;;  %v195_v0 = vpop.permute.xlu1 %194  ;;  %4748 = vmatprep.subr.bf16.mxu0 %v5087_v1 }
  0xc8   :  { %v199_v3 = vsel %vm196_vm10, %v191_v56, %v193_v63  ;;  %v200_v5 = vsel %vm196_vm10, %v193_v63, %v195_v0  ;;  %v306_v7 = vsel %vm201_vm2, %v195_v0, 0 }
  0xc9   :  { %4096 = vmatmul.mubr.msk.bf16.vlgmr.msra.gmra.mrb[0].mxu0 %vm289_vm11, %v19_v61  ;;  %4097 = vmatprep.subr.msk.bf16.mxu1 %vm201_vm2, %v200_v5  ;;  %v300_v19 = vsel %vm201_vm2, %v199_v3, 0  ;;  %vm803_vm2 = vsmask.f32 1280 }
  0xca   :  { %354 = vmatpush1.bf16.msra.mxu1 %v300_v19  ;;  %4749 = vmatpush3.bf16.msra.mxu0 %v242_v6 }
  0xcb   :  { %4750 = vmatprep.subr.bf16.mxu0 %v5087_v1  ;;  %4754 = vmatprep.mubr.msk.bf16.mxu0 %vm5088_vm12, %v5087_v1 }
  0xcd   :  { %4098 = vmatmul.mubr.msk.bf16.vlgmr.msra.gmra.mrb[0].mxu1 %vm289_vm11, %v19_v61 }
  0xce   :  { %4751 = vmatpush3.bf16.msra.mxu0 %v282_v59  ;;  %715 = vmatprep.mubr.bf16.mxu1 %v5085_v24 }
  0xcf   :  { %4752 = vmatprep.subr.bf16.mxu0 %v5087_v1 }
  0xd2   :  { %4753 = vmatpush3.bf16.msra.mxu0 %v306_v7 }
  0xd5   :  { %4755 = vmatmul.mubr.msk.bf16.vlgmr.msra.gmra.mrb[4].mxu0 %vm289_vm11, %v19_v61  ;;  %vm4035_vm11 = vcmask 261120  }
  0xd6   :  { %758 = vmatprep.mubr.bf16.mxu0 %v5085_v24 }
  0xd8   :  { %v287_v8 = vpop.permute.xlu0 %286 }
 0x19c   :  { %v342_v9 = vpop.f32.mrb[0].mxu0 }
 0x19d   :  { %v343_v10 = vadd.f32 %v342_v9, %v287_v8  ;;  %v344_v11 = vpop.f32.mrb[1].mxu0 }
 0x19e   :  { %v345_v12 = vadd.f32 %v344_v11, %v287_v8  ;;  %v346_v13 = vpop.f32.mrb[2].mxu0 }
 0x19f   :  { %v430_v14 = vmax.f32 %v343_v10, 0.0  ;;  %v347_v15 = vpop.f32.mrb[3].mxu0 }
 0x1a0   :  { %v431_v16 = vmax.f32 %v345_v12, 0.0  ;;  %v383_v17 = vpop.f32.mrb[0].mxu1 }
 0x1a1   :  { %v384_v18 = vadd.f32 %v383_v17, %v287_v8  ;;  %v385_v20 = vpop.f32.mrb[1].mxu1  ;;  %v5317_v26 = vpack.c.bf16 %v430_v14, %v430_v14 }
 0x1a2   :  { %v386_v21 = vadd.f32 %v385_v20, %v287_v8  ;;  %v387_v22 = vpop.f32.mrb[2].mxu1  ;;  %v5319_v27 = vpack.c.bf16 %v431_v16, %v431_v16 }
 0x1a3   :  { %v432_v23 = vmax.f32 %v384_v18, 0.0  ;;  %v388_v25 = vpop.f32.mrb[3].mxu1  ;;  %476 = vrot.lane.b32.xlu0 %v5317_v26, %s5078_s19 }
 0x1a4   :  { %v433_v24 = vmax.f32 %v386_v21, 0.0  ;;  %478 = vrot.lane.b32.xlu1 %v5319_v27, %s5078_s19 }
 0x1a5   :  { %v5325_v28 = vpack.c.bf16 %v432_v23, %v432_v23 }
 0x1a6   :  { %v5351_v37 = vpack.c.bf16 %v433_v24, %v433_v24 }
 0x1a7   :  { %494 = vrot.lane.b32.xlu0 %v5325_v28, %s5079_s20 }
 0x1a8   :  { %v424_v29 = vpop.f32.mrb[4].mxu0  ;;  %480 = vrot.lane.b32.xlu1 %v5325_v28, %s5078_s19 }
 0x1a9   :  { %v425_v30 = vadd.f32 %v424_v29, %v287_v8  ;;  %v4756_v31 = vpop.f32.mrb[5].mxu0 }
 0x1aa   :  { %v427_v32 = vpop.f32.mrb[6].mxu0 }
 0x1ab   :  { %v434_v34 = vmax.f32 %v425_v30, 0.0  ;;  %v4757_v35 = vpop.f32.mrb[7].mxu0  ;;  %508 = vrot.lane.b32.xlu0 %v5325_v28, %s5080_s0 }
 0x1ac   :  { %492 = vrot.lane.b32.xlu1 %v5319_v27, %s5079_s20 }
 0x1ad   :  { %v4388_v36 = vpack.c.bf16 %v434_v34, %v434_v34 }
 0x1af   :  { %459 = vst.msk [vmem:[#allocation2 + $0x10] sm:$0xf] %vm458_vm13, %v4388_v36  ;;  %504 = vrot.lane.b32.xlu0 %v5317_v26, %s5080_s0 }
 0x1b0   :  { %506 = vrot.lane.b32.xlu1 %v5319_v27, %s5080_s0 }
 0x1b3   :  { %522 = vrot.lane.b32.xlu0 %v5325_v28, %s5081_s21 }
 0x1b4   :  { %490 = vrot.lane.b32.xlu1 %v5317_v26, %s5079_s20 }
 0x1b6   :  { %v4785_v38 = vld [vmem:[#allocation2 + $0x10] ss:$0 sps:$4 sm:$0xff]  }
 0x1b7   :  { %536 = vrot.lane.b32.xlu0 %v5325_v28, %s5082_s22 }
 0x1b8   :  { %520 = vrot.lane.b32.xlu1 %v5319_v27, %s5081_s21 }
 0x1bb   :  { %532 = vrot.lane.b32.xlu0 %v5317_v26, %s5082_s22 }
 0x1bc   :  { %534 = vrot.lane.b32.xlu1 %v5319_v27, %s5082_s22 }
 0x1bf   :  { %550 = vrot.lane.b32.xlu0 %v5325_v28, %s5083_s23 }
 0x1c0   :  { %482 = vrot.lane.b32.xlu1 %v5351_v37, %s5078_s19 }
 0x1c3   :  { %564 = vrot.lane.b32.xlu0 %v5325_v28, %s5084_s24 }
 0x1c4   :  { %518 = vrot.lane.b32.xlu1 %v5317_v26, %s5081_s21 }
 0x1c7   :  { %560 = vrot.lane.b32.xlu0 %v5317_v26, %s5084_s24 }
 0x1c8   :  { %548 = vrot.lane.b32.xlu1 %v5319_v27, %s5083_s23 }
 0x1cb   :  { %576 = vrot.lane.b32.xlu0 %v5319_v27, %s5086_s25 }
 0x1cc   :  { %562 = vrot.lane.b32.xlu1 %v5319_v27, %s5084_s24 }
 0x1cf   :  { %552 = vrot.lane.b32.xlu0 %v5351_v37, %s5083_s23 }
 0x1d0   :  { %496 = vrot.lane.b32.xlu1 %v5351_v37, %s5079_s20 }
 0x1d3   :  { %484 = vrot.lane.b32.xlu0 %v4785_v38, %s5078_s19 }
 0x1d4   :  { %510 = vrot.lane.b32.xlu1 %v5351_v37, %s5080_s0 }
 0x1d7   :  { %498 = vrot.lane.b32.xlu0 %v4785_v38, %s5079_s20 }
 0x1d8   :  { %546 = vrot.lane.b32.xlu1 %v5317_v26, %s5083_s23 }
 0x1db   :  { %512 = vrot.lane.b32.xlu0 %v4785_v38, %s5080_s0 }
 0x1dc   :  { %524 = vrot.lane.b32.xlu1 %v5351_v37, %s5081_s21 }
 0x1df   :  { %526 = vrot.lane.b32.xlu0 %v4785_v38, %s5081_s21 }
 0x1e0   :  { %538 = vrot.lane.b32.xlu1 %v5351_v37, %s5082_s22 }
 0x1e3   :  { %540 = vrot.lane.b32.xlu0 %v4785_v38, %s5082_s22 }
 0x1e4   :  { %574 = vrot.lane.b32.xlu1 %v5317_v26, %s5086_s25 }
 0x1e7   :  { %566 = vrot.lane.b32.xlu0 %v5351_v37, %s5084_s24 }
 0x1e8   :  { %578 = vrot.lane.b32.xlu1 %v5325_v28, %s5086_s25 }
 0x1eb   :  { %580 = vrot.lane.b32.xlu0 %v5351_v37, %s5086_s25 }
 0x1ec   :  { %554 = vrot.lane.b32.xlu1 %v4785_v38, %s5083_s23 }
 0x1ef   :  { %654 = vperm.xlu0 %4780, %v27_v39  }
 0x1f0   :  { %568 = vrot.lane.b32.xlu1 %v4785_v38, %s5084_s24 }
 0x1f4   :  { %582 = vrot.lane.b32.xlu1 %v4785_v38, %s5086_s25 }
 0x1f8   :  { %659 = vperm.xlu1 %4781, %v28_v40  }
 0x215   :  { %v477_v43 = vpop.permute.xlu0 %476 }
 0x216   :  { %v479_v41 = vpop.permute.xlu1 %478 }
 0x217   :  { %v486_v44 = vsel %vm86_vm0, %v477_v43, %v479_v41 }
 0x218   :  { %v590_v49 = vsel %vm217_vm4, %v5317_v26, %v486_v44 }
 0x219   :  { %v5404_v46 = vpop.permute.xlu0 %494 }
 0x21a   :  { %v481_v45 = vpop.permute.xlu1 %480 }
 0x21b   :  { %v487_v47 = vsel %vm86_vm0, %v479_v41, %v481_v45 }
 0x21c   :  { %v594_v48 = vsel %vm217_vm4, %v5319_v27, %v487_v47 }
 0x21d   :  { %683 = vmatprep.subr.bf16.mxu1 %v594_v48  ;;  %v509_v51 = vpop.permute.xlu0 %508 }
 0x21e   :  { %v493_v50 = vpop.permute.xlu1 %492  ;;  %684 = vmatpush1.bf16.msra.mxu1 %v590_v49 }
 0x21f   :  { %v501_v54 = vsel %vm104_vm1, %v493_v50, %v5404_v46 }
 0x221   :  { %v505_v53 = vpop.permute.xlu0 %504 }
 0x222   :  { %v507_v52 = vpop.permute.xlu1 %506 }
 0x223   :  { %v515_v55 = vsel %vm121_vm3, %v507_v52, %v509_v51  ;;  %v514_v60 = vsel %vm121_vm3, %v505_v53, %v507_v52 }
 0x224   :  { %v610_v56 = vsel %vm217_vm4, %v501_v54, %v515_v55 }
 0x225   :  { %685 = vmatprep.subr.bf16.mxu1 %v610_v56  ;;  %v5415_v58 = vpop.permute.xlu0 %522  ;;  %v4786_v56 = vld [vmem:[%s6456_s1 + $0x8] sm:$0xff]  }
 0x226   :  { %v491_v57 = vpop.permute.xlu1 %490 }
 0x227   :  { %v500_v61 = vsel %vm104_vm1, %v491_v57, %v493_v50 }
 0x228   :  { %v606_v62 = vsel %vm217_vm4, %v500_v61, %v514_v60 }
 0x229   :  { %686 = vmatpush1.bf16.msra.mxu1 %v606_v62  ;;  %v537_v0 = vpop.permute.xlu0 %536 }
 0x22a   :  { %v521_v63 = vpop.permute.xlu1 %520 }
 0x22b   :  { %v529_v5 = vsel %vm136_vm8, %v521_v63, %v5415_v58 }
 0x22d   :  { %v533_v3 = vpop.permute.xlu0 %532 }
 0x22e   :  { %v535_v2 = vpop.permute.xlu1 %534 }
 0x22f   :  { %v543_v6 = vsel %vm151_vm6, %v535_v2, %v537_v0  ;;  %v542_v8 = vsel %vm151_vm6, %v533_v3, %v535_v2 }
 0x230   :  { %v626_v19 = vsel %vm217_vm4, %v529_v5, %v543_v6 }
 0x231   :  { %687 = vmatprep.subr.bf16.mxu1 %v626_v19  ;;  %v5424_v42 = vpop.permute.xlu0 %550 }
 0x232   :  { %v483_v33 = vpop.permute.xlu1 %482 }
 0x233   :  { %v488_v21 = vsel %vm86_vm0, %v481_v45, %v483_v33 }
 0x234   :  { %v598_v27 = vsel %vm217_vm4, %v5325_v28, %v488_v21  ;;  %v4801_v21 = vld [vmem:[%s6458_s3 + $0xd8] sm:$0xff]  }
 0x235   :  { %v5426_v7 = vpop.permute.xlu0 %564 }
 0x236   :  { %v519_v59 = vpop.permute.xlu1 %518 }
 0x237   :  { %v528_v9 = vsel %vm136_vm8, %v519_v59, %v521_v63 }
 0x238   :  { %v622_v10 = vsel %vm217_vm4, %v528_v9, %v542_v8  ;;  %v4789_v8 = vld [vmem:[%s6458_s3 + $0xc0] sm:$0xff]  }
 0x239   :  { %688 = vmatpush1.bf16.msra.mxu1 %v622_v10  ;;  %v561_v12 = vpop.permute.xlu0 %560  ;;  %v4790_v9 = vld [vmem:[%s6458_s3 + $0x80] sm:$0xff]   ;;  %v4791_v10 = vld [vmem:[%s6458_s3 + $0x48] sm:$0xff]  }
 0x23a   :  { %v549_v11 = vpop.permute.xlu1 %548 }
 0x23b   :  { %v557_v15 = vsel %vm166_vm7, %v549_v11, %v5424_v42 }
 0x23d   :  { %v577_v14 = vpop.permute.xlu0 %576 }
 0x23e   :  { %v563_v13 = vpop.permute.xlu1 %562 }
 0x23f   :  { %v571_v16 = vsel %vm181_vm9, %v563_v13, %v5426_v7  ;;  %v570_v30 = vsel %vm181_vm9, %v561_v12, %v563_v13  ;;  %v4793_v12 = vld [vmem:[%s6458_s3 + $0xc8] sm:$0xff]  }
 0x240   :  { %v642_v17 = vsel %vm217_vm4, %v557_v15, %v571_v16  ;;  %v4794_v13 = vld [vmem:[%s6458_s3 + $0x88] sm:$0xff]   ;;  %v4796_v15 = vld [vmem:[%s6458_s3 + $0x10] sm:$0xff]  }
 0x241   :  { %689 = vmatprep.subr.bf16.mxu1 %v642_v17  ;;  %v553_v20 = vpop.permute.xlu0 %552  ;;  %v4797_v16 = vld [vmem:[%s6458_s3 + $0xd0] sm:$0xff]  }
 0x242   :  { %v497_v18 = vpop.permute.xlu1 %496  ;;  %v558_v2 = vsel %vm166_vm7, %v5424_v42, %v553_v20  ;;  %v4787_v42 = vld [vmem:[%s6458_s3 + $0x40] sm:$0xff]   ;;  %v4798_v17 = vld [vmem:[%s6458_s3 + $0x90] sm:$0xff]  }
 0x243   :  { %v502_v28 = vsel %vm104_vm1, %v5404_v46, %v497_v18 }
 0x245   :  { %v485_v23 = vpop.permute.xlu0 %484 }
 0x246   :  { %v511_v22 = vpop.permute.xlu1 %510  ;;  %v489_v25 = vsel %vm86_vm0, %v483_v33, %v485_v23  ;;  %v4803_v23 = vld [vmem:[%s6458_s3 + $0x60] sm:$0xff]   ;;  %vm800_vm0 = vsmask.f32 256 }
 0x247   :  { %v602_v26 = vsel %vm217_vm4, %v5351_v37, %v489_v25  ;;  %v516_v34 = vsel %vm121_vm3, %v509_v51, %v511_v22  ;;  %v4804_v25 = vld [vmem:[%s6458_s3 + $0x20] sm:$0xff]  }
 0x248   :  { %726 = vmatprep.subr.bf16.mxu0 %v602_v26  ;;  %v614_v40 = vsel %vm217_vm4, %v502_v28, %v516_v34  ;;  %v4805_v26 = vld [vmem:[%s6458_s3 + $0xe0] sm:$0xff]   ;;  %v4812_v34 = vld [vmem:[%s6458_s3 + $0x30] sm:$0xff]   ;;  %v4816_v28 = vld [vmem:[%s6458_s3 + $0x38] sm:$0xff]  }
 0x249   :  { %727 = vmatpush1.bf16.msra.mxu0 %v598_v27  ;;  %v499_v29 = vpop.permute.xlu0 %498  ;;  %v4806_v27 = vld [vmem:[%s6458_s3 + $0xa0] sm:$0xff]  }
 0x24a   :  { %v547_v24 = vpop.permute.xlu1 %546  ;;  %v503_v37 = vsel %vm104_vm1, %v497_v18, %v499_v29  ;;  %v4799_v18 = vld [vmem:[%s6458_s3 + $0x58] sm:$0xff]   ;;  %v4808_v29 = vld [vmem:[%s6458_s3 + $0x28] sm:$0xff]   ;;  %vm802_vm1 = vcmask 1041409  }
 0x24b   :  { %v556_v31 = vsel %vm166_vm7, %v547_v24, %v549_v11  ;;  %v4792_v11 = vld [vmem:[%s6458_s3 + $0x8] sm:$0xff]  }
 0x24c   :  { %v638_v32 = vsel %vm217_vm4, %v556_v31, %v570_v30  ;;  %v4807_v24 = vld [vmem:[%s6458_s3 + $0x68] sm:$0xff]  }
 0x24d   :  { %690 = vmatpush1.bf16.msra.mxu1 %v638_v32  ;;  %v513_v36 = vpop.permute.xlu0 %512  ;;  %v4809_v30 = vld [vmem:[%s6458_s3 + $0xe8] sm:$0xff]   ;;  %v4811_v32 = vld [vmem:[%s6458_s3 + $0x70] sm:$0xff]  }
 0x24e   :  { %v525_v35 = vpop.permute.xlu1 %524  ;;  %v517_v38 = vsel %vm121_vm3, %v511_v22, %v513_v36  ;;  %v4802_v22 = vld [vmem:[%s6458_s3 + $0x98] sm:$0xff]   ;;  %v4810_v31 = vld [vmem:[%s6458_s3 + $0xa8] sm:$0xff]   ;;  %v4814_v36 = vld [vmem:[%s6458_s3 + $0xb0] sm:$0xff]  }
 0x24f   :  { %v618_v39 = vsel %vm217_vm4, %v503_v37, %v517_v38  ;;  %v530_v50 = vsel %vm136_vm8, %v5415_v58, %v525_v35  ;;  %v4815_v37 = vld [vmem:[%s6458_s3 + $0x78] sm:$0xff]   ;;  %vm801_vm3 = vmand %vm799_vm15, %vm800_vm0 }
 0x250   :  { %728 = vmatprep.subr.bf16.mxu0 %v618_v39  ;;  %v4817_v38 = vld [vmem:[%s6458_s3 + $0xf8] sm:$0xff]  }
 0x251   :  { %729 = vmatpush1.bf16.msra.mxu0 %v614_v40  ;;  %v527_v43 = vpop.permute.xlu0 %526  ;;  %v4818_v39 = vld [vmem:[%s6458_s3 + $0xb8] sm:$0xff]   ;;  %v4819_v40 = vld [vmem:[%s6458_s3 + $0x140] sm:$0xff]  }
 0x252   :  { %v539_v41 = vpop.permute.xlu1 %538  ;;  %v531_v48 = vsel %vm136_vm8, %v525_v35, %v527_v43  ;;  %v4813_v35 = vld [vmem:[%s6458_s3 + $0xf0] sm:$0xff]   ;;  %v5089_v43 = vmov 1966171168  }
 0x253   :  { %v544_v44 = vsel %vm151_vm6, %v537_v0, %v539_v41 }
 0x254   :  { %v630_v52 = vsel %vm217_vm4, %v530_v50, %v544_v44  ;;  %v785_v44 = vunpack.c.l.s4 %v5089_v43  ;;  %v913_v43 = vld [vmem:[#allocation3 + $0x16] sm:$0x3] }
 0x255   :  { %v541_v47 = vpop.permute.xlu0 %540 }
 0x256   :  { %v575_v45 = vpop.permute.xlu1 %574  ;;  %v545_v49 = vsel %vm151_vm6, %v539_v41, %v541_v47  ;;  %v4822_v41 = vld [vmem:[%s6458_s3 + $0x1c0] sm:$0xff]   ;;  %v786_v47 = vunpack.c.0.s8 %v785_v44  ;;  %vm965_vm6 = vsmask.f32 7938  ;;  %v927_v44 = vld [vmem:[#allocation3 + $0x1a] sm:$0x3] }
 0x257   :  { %v634_v46 = vsel %vm217_vm4, %v531_v48, %v545_v49  ;;  %v584_v51 = vsel %vm196_vm10, %v575_v45, %v577_v14  ;;  %vm966_vm8 = vmand %vm799_vm15, %vm965_vm6 }
 0x258   :  { %730 = vmatprep.subr.bf16.mxu0 %v634_v46  ;;  %v672_v55 = vsel %vm217_vm4, %v584_v51, 0 }
 0x259   :  { %731 = vmatpush1.bf16.msra.mxu0 %v630_v52  ;;  %v567_v57 = vpop.permute.xlu0 %566 }
 0x25a   :  { %v579_v53 = vpop.permute.xlu1 %578  ;;  %v572_v60 = vsel %vm181_vm9, %v5426_v7, %v567_v57  ;;  %v4788_v7 = vld [vmem:[%s6458_s3] sm:$0xff]  }
 0x25b   :  { %v585_v54 = vsel %vm196_vm10, %v577_v14, %v579_v53  ;;  %v646_v5 = vsel %vm217_vm4, %v558_v2, %v572_v60  ;;  %v4795_v14 = vld [vmem:[%s6458_s3 + $0x50] sm:$0xff]  }
 0x25c   :  { %4109 = vmatprep.subr.msk.bf16.mxu1 %vm217_vm4, %v585_v54 }
 0x25d   :  { %692 = vmatpush1.bf16.msra.mxu1 %v672_v55  ;;  %v581_v63 = vpop.permute.xlu0 %580 }
 0x25e   :  { %v555_v58 = vpop.permute.xlu1 %554  ;;  %v586_v6 = vsel %vm196_vm10, %v579_v53, %v581_v63  ;;  %4393 = vmatprep.subr.bf16.mxu1 %v4787_v42  ;;  %v841_v42 = vld [vmem:[#allocation3 + $0x8] sm:$0x3] }
 0x25f   :  { %v559_v62 = vsel %vm166_vm7, %v553_v20, %v555_v58  ;;  %v678_v59 = vsel %vm217_vm4, %v586_v6, 0  ;;  %v4800_v20 = vld [vmem:[%s6458_s3 + $0x18] sm:$0xff]   ;;  %vm967_vm7 = vsmask.f32 7942 }
 0x260   :  { %4110 = vmatmul.mubr.msk.bf16.vlgmr.msra.gmra.mrb[4].mxu1 %vm667_vm14, %v4786_v56 }
 0x261   :  { %4394 = vmatpush3.bf16.msra.mxu1 %v4788_v7  ;;  %v883_v7 = vld [vmem:[#allocation3 + $0x10] sm:$0x3] }
 0x262   :  { %v569_v61 = vpop.permute.xlu1 %568  ;;  %4395 = vmatprep.subr.bf16.mxu1 %v4791_v10 }
 0x263   :  { %v573_v0 = vsel %vm181_vm9, %v567_v57, %v569_v61  ;;  %vm968_vm9 = vmand %vm802_vm1, %vm967_vm7 }
 0x264   :  { %v650_v3 = vsel %vm217_vm4, %v559_v62, %v573_v0 }
 0x265   :  { %732 = vmatprep.subr.bf16.mxu0 %v650_v3  ;;  %4396 = vmatpush3.bf16.msra.mxu1 %v4792_v11  ;;  %v806_v3 = vld [vmem:[#allocation3] sm:$0x3] }
 0x266   :  { %v583_v19 = vpop.permute.xlu1 %582  ;;  %733 = vmatpush1.bf16.msra.mxu0 %v646_v5  ;;  %4397 = vmatprep.subr.bf16.mxu1 %v4795_v14  ;;  %v815_v5 = vld [vmem:[#allocation3 + $0x2] sm:$0x3] }
 0x267   :  { %v587_v33 = vsel %vm196_vm10, %v581_v63, %v583_v19  ;;  %v827_v19 = vld [vmem:[#allocation3 + $0x4] sm:$0x3]  ;;  %vm5646_vm10 = vmor %vm968_vm9, %vm966_vm8 }
 0x268   :  { %4111 = vmatprep.subr.msk.bf16.mxu0 %vm217_vm4, %v587_v33  ;;  %vm804_vm4 = vmand %vm802_vm1, %vm803_vm2 }
 0x269   :  { %4398 = vmatpush3.bf16.msra.mxu1 %v4796_v15  ;;  %vm5596_vm5 = vmor %vm804_vm4, %vm801_vm3 }
 0x26a   :  { %735 = vmatpush1.bf16.msra.mxu0 %v678_v59  ;;  %4399 = vmatprep.subr.bf16.mxu1 %v4799_v18  ;;  %v836_v59 = vld [vmem:[#allocation3 + $0x6] sm:$0x3] }
 0x26b   :  { %4415 = vmatprep.subr.bf16.mxu0 %v4789_v8 }
 0x26d   :  { %4112 = vmatmul.mubr.msk.bf16.vlgmr.msra.gmra.mrb[8].mxu0 %vm667_vm14, %v4786_v56  ;;  %4400 = vmatpush3.bf16.msra.mxu1 %v4800_v20  ;;  %v5590_v56 = vsub.s32 %v786_v47, %v5119_v4 }
 0x26e   :  { %4416 = vmatpush3.bf16.msra.mxu0 %v4790_v9  ;;  %4401 = vmatprep.subr.bf16.mxu1 %v4803_v23  ;;  %v5582_v45 = vpop.permute.xlu0 %654  ;;  %v904_v23 = vld [vmem:[#allocation3 + $0x14] sm:$0x3] }
 0x26f   :  { %4417 = vmatprep.subr.bf16.mxu0 %v4793_v12  ;;  %v850_v12 = vld [vmem:[#allocation3 + $0xa] sm:$0x3] }
 0x271   :  { %4402 = vmatpush3.bf16.msra.mxu1 %v4804_v25 }
 0x272   :  { %4418 = vmatpush3.bf16.msra.mxu0 %v4794_v13  ;;  %4403 = vmatprep.subr.bf16.mxu1 %v4807_v24  ;;  %v855_v13 = vld [vmem:[#allocation3 + $0xc] sm:$0x3] }
 0x273   :  { %4419 = vmatprep.subr.bf16.mxu0 %v4797_v16 }
 0x275   :  { %4404 = vmatpush3.bf16.msra.mxu1 %v4808_v29 }
 0x276   :  { %4420 = vmatpush3.bf16.msra.mxu0 %v4798_v17  ;;  %4405 = vmatprep.subr.bf16.mxu1 %v4811_v32 }
 0x277   :  { %4421 = vmatprep.subr.bf16.mxu0 %v4801_v21  ;;  %v5584_v49 = vpop.permute.xlu1 %659 }
 0x279   :  { %4406 = vmatpush3.bf16.msra.mxu1 %v4812_v34  ;;  %v864_v34 = vld [vmem:[#allocation3 + $0xe] sm:$0x3] }
 0x27a   :  { %4422 = vmatpush3.bf16.msra.mxu0 %v4802_v22  ;;  %4407 = vmatprep.subr.bf16.mxu1 %v4815_v37  ;;  %v892_v22 = vld [vmem:[#allocation3 + $0x12] sm:$0x3] }
 0x27b   :  { %4423 = vmatprep.subr.bf16.mxu0 %v4805_v26 }
 0x27d   :  { %4408 = vmatpush3.bf16.msra.mxu1 %v4816_v28 }
 0x27e   :  { %4424 = vmatpush3.bf16.msra.mxu0 %v4806_v27  ;;  %4437 = vmatprep.subr.bf16.mxu1 %v4819_v40 }
 0x27f   :  { %4425 = vmatprep.subr.bf16.mxu0 %v4809_v30  ;;  %v918_v30 = vld [vmem:[#allocation3 + $0x18] sm:$0x3] }
 0x282   :  { %4426 = vmatpush3.bf16.msra.mxu0 %v4810_v31 }
 0x283   :  { %4427 = vmatprep.subr.bf16.mxu0 %v4813_v35 }
 0x286   :  { %4428 = vmatpush3.bf16.msra.mxu0 %v4814_v36 }
 0x287   :  { %4429 = vmatprep.subr.bf16.mxu0 %v4817_v38 }
 0x28a   :  { %4430 = vmatpush3.bf16.msra.mxu0 %v4818_v39 }
 0x28b   :  { %4459 = vmatprep.subr.bf16.mxu0 %v4822_v41 }
 0x333   :  { %v717_v48 = vpop.f32.mrb[4].mxu1 }
 0x334   :  { %v718_v50 = vadd.f32 %v717_v48, %v5582_v45  ;;  %v719_v46 = vpop.f32.mrb[5].mxu1 }
 0x335   :  { %v720_v51 = vadd.f32 %v719_v46, %v5582_v45  ;;  %v721_v52 = vpop.f32.mrb[6].mxu1 }
 0x336   :  { %v769_v53 = vmax.f32 %v718_v50, 0.0  ;;  %v722_v54 = vadd.f32 %v721_v52, %v5584_v49  ;;  %v723_v55 = vpop.f32.mrb[7].mxu1 }
 0x337   :  { %v770_v57 = vmax.f32 %v720_v51, 0.0  ;;  %v724_v58 = vadd.f32 %v723_v55, %v5584_v49  ;;  %v932_v51 = vld [vmem:[#allocation3 + $0x1c] sm:$0x3] }
 0x338   :  { %v773_v60 = vmax.f32 %v722_v54, 0.0 }
 0x339   :  { %v4113_v61 = vpack.c.bf16 %v770_v57, %v769_v53  ;;  %v774_v62 = vmax.f32 %v724_v58, 0.0 }
 0x33b   :  { %v790_v63 = vrot.slane %v4113_v61, %v5590_v56  ;;  %v4118_v0 = vpack.c.bf16 %v774_v62, %v773_v60  ;;  %v941_v60 = vld [vmem:[#allocation3 + $0x1e] sm:$0x3] }
 0x33d   :  { %v797_v4 = vrot.slane %v790_v63, %v5590_v56  ;;  %v818_v6 = vcombine.high %v790_v63, %v790_v63  ;;  %v874_v33 = vrot.slane %v4118_v0, %v5590_v56 }
 0x33f   :  { %v807_v8 = vsel %vm5596_vm5, %v797_v4, %v806_v3  ;;  %v810_v9 = vshrl.u32 %v797_v4, 16  ;;  %v825_v10 = vrot.slane %v818_v6, %v5590_v56  ;;  %v839_v11 = vcombine.high %v797_v4, %v797_v4 }
 0x340   :  { %808 = vst [vmem:[#allocation3] sm:$0x3] %v807_v8  ;;  %v881_v14 = vrot.slane %v874_v33, %v5590_v56  ;;  %v895_v15 = vcombine.high %v874_v33, %v874_v33  ;;  %v760_v16 = vpop.f32.mrb[8].mxu0 }
 0x341   :  { %v816_v17 = vsel %vm5596_vm5, %v810_v9, %v815_v5  ;;  %v828_v18 = vsel %vm5596_vm5, %v825_v10, %v827_v19  ;;  %v831_v20 = vshrl.u32 %v825_v10, 16  ;;  %v842_v21 = vsel %vm5596_vm5, %v839_v11, %v841_v42  ;;  %v762_v25 = vpop.f32.mrb[9].mxu0 }
 0x342   :  { %817 = vst [vmem:[#allocation3 + $0x2] sm:$0x3] %v816_v17  ;;  %829 = vst [vmem:[#allocation3 + $0x4] sm:$0x3] %v828_v18  ;;  %v845_v26 = vshrl.u32 %v839_v11, 16  ;;  %v853_v27 = vcombine.high %v825_v10, %v825_v10  ;;  %v884_v24 = vsel %vm5596_vm5, %v881_v14, %v883_v7  ;;  %v887_v29 = vshrl.u32 %v881_v14, 16 }
 0x343   :  { %843 = vst [vmem:[#allocation3 + $0x8] sm:$0x3] %v842_v21  ;;  %v764_v31 = vpop.f32.mrb[10].mxu0  ;;  %v837_v32 = vsel %vm5596_vm5, %v831_v20, %v836_v59  ;;  %885 = vst [vmem:[#allocation3 + $0x10] sm:$0x3] %v884_v24  ;;  %v902_v35 = vrot.slane %v895_v15, %v5590_v56  ;;  %v916_v36 = vcombine.high %v881_v14, %v881_v14 }
 0x344   :  { %v761_v37 = vadd.f32 %v760_v16, %v5582_v45  ;;  %v766_v38 = vpop.f32.mrb[11].mxu0  ;;  %838 = vst [vmem:[#allocation3 + $0x6] sm:$0x3] %v837_v32  ;;  %v851_v28 = vsel %vm5596_vm5, %v845_v26, %v850_v12  ;;  %v856_v39 = vsel %vm5596_vm5, %v853_v27, %v855_v13  ;;  %v859_v40 = vshrl.u32 %v853_v27, 16 }
 0x345   :  { %v893_v41 = vsel %vm5596_vm5, %v887_v29, %v892_v22  ;;  %852 = vst [vmem:[#allocation3 + $0xa] sm:$0x3] %v851_v28  ;;  %857 = vst [vmem:[#allocation3 + $0xc] sm:$0x3] %v856_v39  ;;  %v905_v47 = vsel %vm5596_vm5, %v902_v35, %v904_v23  ;;  %v908_v48 = vshrl.u32 %v902_v35, 16  ;;  %v919_v50 = vsel %vm5596_vm5, %v916_v36, %v918_v30 }
 0x346   :  { %894 = vst [vmem:[#allocation3 + $0x12] sm:$0x3] %v893_v41  ;;  %v922_v46 = vshrl.u32 %v916_v36, 16  ;;  %v865_v52 = vsel %vm5596_vm5, %v859_v40, %v864_v34  ;;  %906 = vst [vmem:[#allocation3 + $0x14] sm:$0x3] %v905_v47  ;;  %v930_v53 = vcombine.high %v902_v35, %v902_v35  ;;  %v771_v54 = vmax.f32 %v761_v37, 0.0 }
 0x347   :  { %920 = vst [vmem:[#allocation3 + $0x18] sm:$0x3] %v919_v50  ;;  %v763_v55 = vadd.f32 %v762_v25, %v5582_v45  ;;  %866 = vst [vmem:[#allocation3 + $0xe] sm:$0x3] %v865_v52  ;;  %v914_v57 = vsel %vm5596_vm5, %v908_v48, %v913_v43  ;;  %v765_v61 = vadd.f32 %v764_v31, %v5584_v49  ;;  %v970_v13 = vld [vmem:[#allocation3] sm:$0x3] }
 0x348   :  { %v928_v58 = vsel %vm5596_vm5, %v922_v46, %v927_v44  ;;  %v767_v62 = vadd.f32 %v766_v38, %v5584_v49  ;;  %915 = vst [vmem:[#allocation3 + $0x16] sm:$0x3] %v914_v57  ;;  %v933_v63 = vsel %vm5596_vm5, %v930_v53, %v932_v51  ;;  %v936_v0 = vshrl.u32 %v930_v53, 16 }
 0x349   :  { %929 = vst [vmem:[#allocation3 + $0x1a] sm:$0x3] %v928_v58  ;;  %v772_v3 = vmax.f32 %v763_v55, 0.0  ;;  %934 = vst [vmem:[#allocation3 + $0x1c] sm:$0x3] %v933_v63  ;;  %v775_v5 = vmax.f32 %v765_v61, 0.0 }
 0x34a   :  { %v942_v45 = vsel %vm5596_vm5, %v936_v0, %v941_v60  ;;  %v776_v49 = vmax.f32 %v767_v62, 0.0  ;;  %v974_v7 = vld [vmem:[#allocation3 + $0x2] sm:$0x3]  ;;  %v989_v14 = vld [vmem:[#allocation3 + $0x4] sm:$0x3] }
 0x34b   :  { %v4123_v4 = vpack.c.bf16 %v772_v3, %v771_v54  ;;  %943 = vst [vmem:[#allocation3 + $0x1e] sm:$0x3] %v942_v45  ;;  %v993_v15 = vld [vmem:[#allocation3 + $0x6] sm:$0x3]  ;;  %v1001_v23 = vld [vmem:[#allocation3 + $0x8] sm:$0x3] }
 0x34c   :  { %v4124_v19 = vpack.c.bf16 %v776_v49, %v775_v5  ;;  %v1005_v25 = vld [vmem:[#allocation3 + $0xa] sm:$0x3]  ;;  %v1039_v36 = vld [vmem:[#allocation3 + $0x10] sm:$0x3]  ;;  %v1013_v41 = vld [vmem:[#allocation3 + $0xc] sm:$0x3] }
 0x34d   :  { %v953_v6 = vrot.slane %v4123_v4, %v5590_v56  ;;  %v1043_v12 = vld [vmem:[#allocation3 + $0x12] sm:$0x3]  ;;  %v1058_v51 = vld [vmem:[#allocation3 + $0x14] sm:$0x3] }
 0x34e   :  { %v1027_v2 = vrot.slane %v4124_v19, %v5590_v56  ;;  %v1017_v35 = vld [vmem:[#allocation3 + $0xe] sm:$0x3]  ;;  %v1070_v52 = vld [vmem:[#allocation3 + $0x18] sm:$0x3] }
 0x34f   :  { %v960_v59 = vrot.slane %v953_v6, %v5590_v56  ;;  %v977_v42 = vcombine.high %v953_v6, %v953_v6  ;;  %v1062_v30 = vld [vmem:[#allocation3 + $0x16] sm:$0x3]  ;;  %v4820_v49 = vld [vmem:[%s6458_s3 + $0x100] sm:$0xff]  }
 0x350   :  { %v1034_v16 = vrot.slane %v1027_v2, %v5590_v56  ;;  %v1046_v17 = vcombine.high %v1027_v2, %v1027_v2  ;;  %v1074_v31 = vld [vmem:[#allocation3 + $0x1a] sm:$0x3]  ;;  %v1082_v60 = vld [vmem:[#allocation3 + $0x1c] sm:$0x3] }
 0x351   :  { %v962_v8 = vshll.u32 %v960_v59, 16  ;;  %v975_v9 = vsel %vm5646_vm10, %v960_v59, %v974_v7  ;;  %v984_v10 = vrot.slane %v977_v42, %v5590_v56  ;;  %v996_v11 = vcombine.high %v960_v59, %v960_v59  ;;  %v4823_v42 = vld [vmem:[%s6458_s3 + $0x180] sm:$0xff]   ;;  %v4824_v2 = vld [vmem:[%s6458_s3 + $0x148] sm:$0xff]  }
 0x352   :  { %976 = vst [vmem:[#allocation3 + $0x2] sm:$0x3] %v975_v9  ;;  %v1036_v24 = vshll.u32 %v1034_v16, 16  ;;  %v1044_v29 = vsel %vm5646_vm10, %v1034_v16, %v1043_v12  ;;  %v1053_v37 = vrot.slane %v1046_v17, %v5590_v56  ;;  %v1065_v38 = vcombine.high %v1034_v16, %v1034_v16  ;;  %v1086_v50 = vld [vmem:[#allocation3 + $0x1e] sm:$0x3]  ;;  %v4827_v12 = vld [vmem:[%s6458_s3 + $0x188] sm:$0xff]  }
 0x353   :  { %v971_v18 = vsel %vm5646_vm10, %v962_v8, %v970_v13  ;;  %v986_v20 = vshll.u32 %v984_v10, 16  ;;  %v994_v21 = vsel %vm5646_vm10, %v984_v10, %v993_v15  ;;  %v998_v22 = vshll.u32 %v996_v11, 16  ;;  %1045 = vst [vmem:[#allocation3 + $0x12] sm:$0x3] %v1044_v29  ;;  %v4826_v8 = vld [vmem:[%s6458_s3 + $0x1c8] sm:$0xff]   ;;  %v4830_v13 = vld [vmem:[%s6458_s3 + $0x1d0] sm:$0xff]  }
 0x354   :  { %972 = vst [vmem:[#allocation3] sm:$0x3] %v971_v18  ;;  %995 = vst [vmem:[#allocation3 + $0x6] sm:$0x3] %v994_v21  ;;  %v1006_v26 = vsel %vm5646_vm10, %v996_v11, %v1005_v25  ;;  %v1008_v27 = vcombine.high %v984_v10, %v984_v10  ;;  %v1040_v40 = vsel %vm5646_vm10, %v1036_v24, %v1039_v36  ;;  %v1055_v43 = vshll.u32 %v1053_v37, 16  ;;  %v4825_v10 = vld [vmem:[%s6458_s3 + $0x108] sm:$0xff]  }
 0x355   :  { %v990_v32 = vsel %vm5646_vm10, %v986_v20, %v989_v14  ;;  %v1002_v34 = vsel %vm5646_vm10, %v998_v22, %v1001_v23  ;;  %1007 = vst [vmem:[#allocation3 + $0xa] sm:$0x3] %v1006_v26  ;;  %1041 = vst [vmem:[#allocation3 + $0x10] sm:$0x3] %v1040_v40  ;;  %v1063_v44 = vsel %vm5646_vm10, %v1053_v37, %v1062_v30  ;;  %v1067_v47 = vshll.u32 %v1065_v38, 16  ;;  %v4828_v11 = vld [vmem:[%s6458_s3 + $0x150] sm:$0xff]  }
 0x356   :  { %991 = vst [vmem:[#allocation3 + $0x4] sm:$0x3] %v990_v32  ;;  %1003 = vst [vmem:[#allocation3 + $0x8] sm:$0x3] %v1002_v34  ;;  %v1010_v28 = vshll.u32 %v1008_v27, 16  ;;  %v1018_v39 = vsel %vm5646_vm10, %v1008_v27, %v1017_v35  ;;  %v1075_v48 = vsel %vm5646_vm10, %v1065_v38, %v1074_v31  ;;  %v1077_v53 = vcombine.high %v1053_v37, %v1053_v37  ;;  %v4829_v14 = vld [vmem:[%s6458_s3 + $0x110] sm:$0xff]  }
 0x357   :  { %1019 = vst [vmem:[#allocation3 + $0xe] sm:$0x3] %v1018_v39  ;;  %1064 = vst [vmem:[#allocation3 + $0x16] sm:$0x3] %v1063_v44  ;;  %v1059_v54 = vsel %vm5646_vm10, %v1055_v43, %v1058_v51  ;;  %v1071_v55 = vsel %vm5646_vm10, %v1067_v47, %v1070_v52  ;;  %v4832_v15 = vld [vmem:[%s6458_s3 + $0x158] sm:$0xff]   ;;  %v4831_v16 = vld [vmem:[%s6458_s3 + $0x190] sm:$0xff]  }
 0x358   :  { %v1014_v46 = vsel %vm5646_vm10, %v1010_v28, %v1013_v41  ;;  %1076 = vst [vmem:[#allocation3 + $0x1a] sm:$0x3] %v1075_v48  ;;  %1060 = vst [vmem:[#allocation3 + $0x14] sm:$0x3] %v1059_v54  ;;  %v1079_v57 = vshll.u32 %v1077_v53, 16  ;;  %v1087_v58 = vsel %vm5646_vm10, %v1077_v53, %v1086_v50  ;;  %v4834_v17 = vld [vmem:[%s6458_s3 + $0x1d8] sm:$0xff]  }
 0x359   :  { %1015 = vst [vmem:[#allocation3 + $0xc] sm:$0x3] %v1014_v46  ;;  %1072 = vst [vmem:[#allocation3 + $0x18] sm:$0x3] %v1071_v55  ;;  %v4833_v18 = vld [vmem:[%s6458_s3 + $0x118] sm:$0xff]   ;;  %v4836_v20 = vld [vmem:[%s6458_s3 + $0x160] sm:$0xff]  }
 0x35a   :  { %1088 = vst [vmem:[#allocation3 + $0x1e] sm:$0x3] %v1087_v58  ;;  %v1083_v61 = vsel %vm5646_vm10, %v1079_v57, %v1082_v60  ;;  %v4835_v21 = vld [vmem:[%s6458_s3 + $0x198] sm:$0xff]   ;;  %v4838_v22 = vld [vmem:[%s6458_s3 + $0x1e0] sm:$0xff]   ;;  %v4840_v25 = vld [vmem:[%s6458_s3 + $0x168] sm:$0xff]  }
 0x35b   :  { %1084 = vst [vmem:[#allocation3 + $0x1c] sm:$0x3] %v1083_v61  ;;  %v4837_v23 = vld [vmem:[%s6458_s3 + $0x120] sm:$0xff]   ;;  %v4842_v27 = vld [vmem:[%s6458_s3 + $0x1e8] sm:$0xff]   ;;  %v4844_v29 = vld [vmem:[%s6458_s3 + $0x170] sm:$0xff]  }
 0x35c   :  { %v4839_v26 = vld [vmem:[%s6458_s3 + $0x1a0] sm:$0xff]   ;;  %v4841_v24 = vld [vmem:[%s6458_s3 + $0x128] sm:$0xff]   ;;  %v4846_v32 = vld [vmem:[%s6458_s3 + $0x1f0] sm:$0xff]  }
 0x35d   :  { %v1089_v62 = vld [vmem:[#allocation3] sm:$0xff]  ;;  %v4843_v31 = vld [vmem:[%s6458_s3 + $0x1a8] sm:$0xff]   ;;  %v4852_v40 = vld [vmem:[%s6458_s3 + $0x240] sm:$0xff]  }
 0x35e   :  { %v1620_v63 = vrot.slane %v1089_v62, %v5590_v56  ;;  %v1613_v0 = vcombine.high %v1089_v62, %v1089_v62  ;;  %v4845_v34 = vld [vmem:[%s6458_s3 + $0x130] sm:$0xff]   ;;  %v4848_v36 = vld [vmem:[%s6458_s3 + $0x178] sm:$0xff]   ;;  %v4854_v43 = vld [vmem:[%s6458_s3 + $0x2c0] sm:$0xff]  }
 0x35f   :  { %v4847_v37 = vld [vmem:[%s6458_s3 + $0x1b0] sm:$0xff]   ;;  %v4850_v38 = vld [vmem:[%s6458_s3 + $0x1f8] sm:$0xff]   ;;  %v4853_v44 = vld [vmem:[%s6458_s3 + $0x200] sm:$0xff]  }
 0x360   :  { %v1628_v3 = vcombine.high %v1620_v63, %v1620_v63  ;;  %v1627_v45 = vrot.slane %v1613_v0, %v5590_v56  ;;  %v1636_v4 = vrot.slane %v1620_v63, %v5590_v56  ;;  %v5761_v30 = vld [vmem:[#allocation3 + $0x8] sm:$0xff]  ;;  %v4856_v48 = vld [vmem:[%s6458_s3 + $0x248] sm:$0xff]   ;;  %v4860_v54 = vld [vmem:[%s6458_s3 + $0x250] sm:$0xff]  }
 0x361   :  { %v5774_v35 = vrot.slane %v5761_v30, %v5590_v56  ;;  %v4849_v28 = vld [vmem:[%s6458_s3 + $0x138] sm:$0xff]   ;;  %v4855_v50 = vld [vmem:[%s6458_s3 + $0x280] sm:$0xff]   ;;  %v4858_v51 = vld [vmem:[%s6458_s3 + $0x2c8] sm:$0xff]  }
 0x362   :  { %v1650_v5 = vrot.slane %v1628_v3, %v5590_v56  ;;  %v1629_v6 = vcombine.high %v1627_v45, %v1627_v45  ;;  %v5695_v19 = vrot.slane %v1627_v45, %v5590_v56  ;;  %v1658_v7 = vcombine.high %v1636_v4, %v1636_v4  ;;  %v4851_v41 = vld [vmem:[%s6458_s3 + $0x1b8] sm:$0xff]   ;;  %v4857_v53 = vld [vmem:[%s6458_s3 + $0x208] sm:$0xff]   ;;  %v4862_v57 = vld [vmem:[%s6458_s3 + $0x2d0] sm:$0xff]  }
 0x363   :  { %v1677_v39 = vcombine.high %v5774_v35, %v5774_v35  ;;  %v4859_v55 = vld [vmem:[%s6458_s3 + $0x288] sm:$0xff]   ;;  %v4861_v58 = vld [vmem:[%s6458_s3 + $0x210] sm:$0xff]   ;;  %v4864_v60 = vld [vmem:[%s6458_s3 + $0x258] sm:$0xff]  }
 0x364   :  { %3409 = vmatprep.mubr.bf16.mxu1 %v1650_v5  ;;  %v1660_v33 = vcombine.high %v1650_v5, %v1650_v5  ;;  %v1657_v59 = vrot.slane %v1629_v6, %v5590_v56  ;;  %v1659_v46 = vcombine.high %v5695_v19, %v5695_v19  ;;  %v4863_v61 = vld [vmem:[%s6458_s3 + $0x290] sm:$0xff]   ;;  %v4866_v62 = vld [vmem:[%s6458_s3 + $0x2d8] sm:$0xff]   ;;  %v4868_v0 = vld [vmem:[%s6458_s3 + $0x260] sm:$0xff]  }
 0x365   :  { %3410 = vmatmul.mubr.bf16.vlgmr.msra.gmra.mrb[8].mxu1 %v1636_v4  ;;  %v1699_v47 = vrot.slane %v1677_v39, %v5590_v56  ;;  %v4865_v63 = vld [vmem:[%s6458_s3 + $0x218] sm:$0xff]   ;;  %v4870_v45 = vld [vmem:[%s6458_s3 + $0x2e0] sm:$0xff]   ;;  %v4872_v5 = vld [vmem:[%s6458_s3 + $0x268] sm:$0xff]  }
 0x366   :  { %4438 = vmatpush3.bf16.msra.mxu1 %v4820_v49  ;;  %3449 = vmatprep.mubr.bf16.mxu0 %v1660_v33  ;;  %v1661_v9 = vcombine.high %v1657_v59, %v1657_v59  ;;  %v4867_v3 = vld [vmem:[%s6458_s3 + $0x298] sm:$0xff]   ;;  %v4869_v4 = vld [vmem:[%s6458_s3 + $0x220] sm:$0xff]   ;;  %v4874_v6 = vld [vmem:[%s6458_s3 + $0x2e8] sm:$0xff]   ;;  %v1662_v33 = vcombine.high %v5761_v30, %v5761_v30 }
 0x367   :  { %3489 = vmatprep.mubr.bf16.mxu1 %v1657_v59  ;;  %3450 = vmatmul.mubr.bf16.vlgmr.msra.gmra.mrb[12].mxu0 %v1658_v7  ;;  %v1709_v52 = vcombine.high %v1699_v47, %v1699_v47  ;;  %v4871_v49 = vld [vmem:[%s6458_s3 + $0x2a0] sm:$0xff]   ;;  %v4876_v59 = vld [vmem:[%s6458_s3 + $0x270] sm:$0xff]  }
 0x368   :  { %4460 = vmatpush3.bf16.msra.mxu0 %v4823_v42  ;;  %4439 = vmatprep.subr.bf16.mxu1 %v4824_v2  ;;  %v4875_v42 = vld [vmem:[%s6458_s3 + $0x2a8] sm:$0xff]   ;;  %v4878_v2 = vld [vmem:[%s6458_s3 + $0x2f0] sm:$0xff]   ;;  %v4902_v39 = vld [vmem:[%s6458_s3 + $0x320] sm:$0xff]  }
 0x369   :  { %3529 = vmatprep.mubr.bf16.mxu0 %v1661_v9  ;;  %4461 = vmatprep.subr.bf16.mxu0 %v4826_v8  ;;  %v4877_v7 = vld [vmem:[%s6458_s3 + $0x230] sm:$0xff]   ;;  %v5881_v8 = vrot.slane %v1662_v33, %v5590_v56  ;;  %v4880_v9 = vld [vmem:[%s6458_s3 + $0x278] sm:$0xff]  }
 0x36a   :  { %4440 = vmatpush3.bf16.msra.mxu1 %v4825_v10  ;;  %v4879_v10 = vld [vmem:[%s6458_s3 + $0x2b0] sm:$0xff]  }
 0x36b   :  { %4441 = vmatprep.subr.bf16.mxu1 %v4828_v11  ;;  %v4882_v11 = vld [vmem:[%s6458_s3 + $0x2f8] sm:$0xff]   ;;  %v4895_v30 = vld [vmem:[%s6458_s3 + $0x3d0] sm:$0xff]  }
 0x36c   :  { %4462 = vmatpush3.bf16.msra.mxu0 %v4827_v12  ;;  %v4881_v12 = vld [vmem:[%s6458_s3 + $0x238] sm:$0xff]   ;;  %v4925_v33 = vld [vmem:[%s6458_s3 + $0x450] sm:$0xff]  }
 0x36d   :  { %4463 = vmatprep.subr.bf16.mxu0 %v4830_v13  ;;  %v1678_v13 = vcombine.high %v5881_v8, %v5881_v8 }
 0x36e   :  { %4442 = vmatpush3.bf16.msra.mxu1 %v4829_v14  ;;  %v4884_v14 = vld [vmem:[%s6458_s3 + $0x340] sm:$0xff]  }
 0x36f   :  { %4443 = vmatprep.subr.bf16.mxu1 %v4832_v15  ;;  %v4883_v15 = vld [vmem:[%s6458_s3 + $0x2b8] sm:$0xff]  }
 0x370   :  { %4464 = vmatpush3.bf16.msra.mxu0 %v4831_v16  ;;  %v1685_v16 = vrot.slane %v5774_v35, %v5590_v56  ;;  %v4899_v35 = vld [vmem:[%s6458_s3 + $0x3d8] sm:$0xff]  }
 0x371   :  { %4465 = vmatprep.subr.bf16.mxu0 %v4834_v17  ;;  %v4887_v17 = vld [vmem:[%s6458_s3 + $0x3c0] sm:$0xff]  }
 0x372   :  { %4444 = vmatpush3.bf16.msra.mxu1 %v4833_v18  ;;  %v4885_v18 = vld [vmem:[%s6458_s3 + $0x300] sm:$0xff]  }
 0x373   :  { %4445 = vmatprep.subr.bf16.mxu1 %v4836_v20  ;;  %v1706_v20 = vrot.slane %v1678_v13, %v5590_v56  ;;  %v4935_v13 = vld [vmem:[%s6458_s3 + $0x4e0] sm:$0xff]  }
 0x374   :  { %4466 = vmatpush3.bf16.msra.mxu0 %v4835_v21  ;;  %v4889_v21 = vld [vmem:[%s6458_s3 + $0x348] sm:$0xff]  }
 0x375   :  { %4467 = vmatprep.subr.bf16.mxu0 %v4838_v22  ;;  %v4888_v22 = vld [vmem:[%s6458_s3 + $0x380] sm:$0xff]  }
 0x376   :  { %4446 = vmatpush3.bf16.msra.mxu1 %v4837_v23  ;;  %v1707_v23 = vcombine.high %v1685_v16, %v1685_v16 }
 0x377   :  { %4447 = vmatprep.subr.bf16.mxu1 %v4840_v25  ;;  %v4891_v25 = vld [vmem:[%s6458_s3 + $0x3c8] sm:$0xff]  }
 0x378   :  { %4468 = vmatpush3.bf16.msra.mxu0 %v4839_v26  ;;  %v1710_v26 = vcombine.high %v1706_v20, %v1706_v20 }
 0x379   :  { %4469 = vmatprep.subr.bf16.mxu0 %v4842_v27  ;;  %v4890_v27 = vld [vmem:[%s6458_s3 + $0x308] sm:$0xff]  }
 0x37a   :  { %4448 = vmatpush3.bf16.msra.mxu1 %v4841_v24  ;;  %v4893_v24 = vld [vmem:[%s6458_s3 + $0x350] sm:$0xff]  }
 0x37b   :  { %4449 = vmatprep.subr.bf16.mxu1 %v4844_v29  ;;  %v4892_v29 = vld [vmem:[%s6458_s3 + $0x388] sm:$0xff]  }
 0x37c   :  { %4470 = vmatpush3.bf16.msra.mxu0 %v4843_v31  ;;  %v4894_v31 = vld [vmem:[%s6458_s3 + $0x310] sm:$0xff]  }
 0x37d   :  { %4471 = vmatprep.subr.bf16.mxu0 %v4846_v32  ;;  %v4897_v32 = vld [vmem:[%s6458_s3 + $0x358] sm:$0xff]  }
 0x37e   :  { %4450 = vmatpush3.bf16.msra.mxu1 %v4845_v34  ;;  %v4896_v34 = vld [vmem:[%s6458_s3 + $0x390] sm:$0xff]  }
 0x37f   :  { %4451 = vmatprep.subr.bf16.mxu1 %v4848_v36  ;;  %v4898_v36 = vld [vmem:[%s6458_s3 + $0x318] sm:$0xff]  }
 0x380   :  { %4472 = vmatpush3.bf16.msra.mxu0 %v4847_v37  ;;  %v4901_v37 = vld [vmem:[%s6458_s3 + $0x360] sm:$0xff]  }
 0x381   :  { %4473 = vmatprep.subr.bf16.mxu0 %v4850_v38  ;;  %v4900_v38 = vld [vmem:[%s6458_s3 + $0x398] sm:$0xff]  }
 0x382   :  { %4452 = vmatpush3.bf16.msra.mxu1 %v4849_v28  ;;  %v4903_v28 = vld [vmem:[%s6458_s3 + $0x3e0] sm:$0xff]  }
 0x383   :  { %4481 = vmatprep.subr.bf16.mxu1 %v4852_v40  ;;  %v4905_v40 = vld [vmem:[%s6458_s3 + $0x368] sm:$0xff]  }
 0x384   :  { %4474 = vmatpush3.bf16.msra.mxu0 %v4851_v41  ;;  %v4904_v41 = vld [vmem:[%s6458_s3 + $0x3a0] sm:$0xff]  }
 0x385   :  { %3490 = vmatmul.mubr.bf16.vlgmr.msra.gmra.mrb[12].mxu1 %v5695_v19  ;;  %4503 = vmatprep.subr.bf16.mxu0 %v4854_v43  ;;  %v4873_v19 = vld [vmem:[%s6458_s3 + $0x228] sm:$0xff]  }
 0x386   :  { %4482 = vmatpush3.bf16.msra.mxu1 %v4853_v44  ;;  %3569 = vmatprep.mubr.bf16.mxu1 %v1699_v47  ;;  %v4907_v43 = vld [vmem:[%s6458_s3 + $0x3e8] sm:$0xff]   ;;  %v4909_v47 = vld [vmem:[%s6458_s3 + $0x370] sm:$0xff]  }
 0x387   :  { %3530 = vmatmul.mubr.bf16.vlgmr.msra.gmra.mrb[16].mxu0 %v1659_v46  ;;  %4483 = vmatprep.subr.bf16.mxu1 %v4856_v48  ;;  %v4906_v44 = vld [vmem:[%s6458_s3 + $0x328] sm:$0xff]   ;;  %v4911_v46 = vld [vmem:[%s6458_s3 + $0x3f0] sm:$0xff]  }
 0x388   :  { %4504 = vmatpush3.bf16.msra.mxu0 %v4855_v50  ;;  %3609 = vmatprep.mubr.bf16.mxu0 %v1709_v52  ;;  %v5975_v48 = vld [vmem:[#allocation3 + $0x10] sm:$0xff] }
 0x389   :  { %4505 = vmatprep.subr.bf16.mxu0 %v4858_v51  ;;  %v4908_v50 = vld [vmem:[%s6458_s3 + $0x3a8] sm:$0xff]   ;;  %v4910_v51 = vld [vmem:[%s6458_s3 + $0x330] sm:$0xff]   ;;  %v5988_v52 = vrot.slane %v5975_v48, %v5590_v56 }
 0x38a   :  { %4484 = vmatpush3.bf16.msra.mxu1 %v4857_v53  ;;  %v4913_v53 = vld [vmem:[%s6458_s3 + $0x378] sm:$0xff]  }
 0x38b   :  { %4485 = vmatprep.subr.bf16.mxu1 %v4860_v54  ;;  %v4912_v54 = vld [vmem:[%s6458_s3 + $0x3b0] sm:$0xff]  }
 0x38c   :  { %4506 = vmatpush3.bf16.msra.mxu0 %v4859_v55  ;;  %v4915_v55 = vld [vmem:[%s6458_s3 + $0x3f8] sm:$0xff]  }
 0x38d   :  { %4507 = vmatprep.subr.bf16.mxu0 %v4862_v57  ;;  %v4914_v57 = vld [vmem:[%s6458_s3 + $0x338] sm:$0xff]  }
 0x38e   :  { %4486 = vmatpush3.bf16.msra.mxu1 %v4861_v58  ;;  %v1726_v58 = vcombine.high %v5988_v52, %v5988_v52 }
 0x38f   :  { %4487 = vmatprep.subr.bf16.mxu1 %v4864_v60  ;;  %v4917_v60 = vld [vmem:[%s6458_s3 + $0x440] sm:$0xff]  }
 0x390   :  { %4508 = vmatpush3.bf16.msra.mxu0 %v4863_v61  ;;  %v4916_v61 = vld [vmem:[%s6458_s3 + $0x3b8] sm:$0xff]  }
 0x391   :  { %4509 = vmatprep.subr.bf16.mxu0 %v4866_v62  ;;  %v1692_v62 = vrot.slane %v5881_v8, %v5590_v56  ;;  %v4928_v8 = vld [vmem:[%s6458_s3 + $0x490] sm:$0xff]  }
 0x392   :  { %4488 = vmatpush3.bf16.msra.mxu1 %v4865_v63  ;;  %v4919_v63 = vld [vmem:[%s6458_s3 + $0x4c0] sm:$0xff]  }
 0x393   :  { %4489 = vmatprep.subr.bf16.mxu1 %v4868_v0  ;;  %v4918_v0 = vld [vmem:[%s6458_s3 + $0x400] sm:$0xff]  }
 0x394   :  { %4510 = vmatpush3.bf16.msra.mxu0 %v4867_v3  ;;  %v1748_v3 = vrot.slane %v1726_v58, %v5590_v56  ;;  %v4968_v58 = vld [vmem:[%s6458_s3 + $0x5e0] sm:$0xff]  }
 0x395   :  { %4511 = vmatprep.subr.bf16.mxu0 %v4870_v45  ;;  %v4921_v45 = vld [vmem:[%s6458_s3 + $0x448] sm:$0xff]  }
 0x396   :  { %4490 = vmatpush3.bf16.msra.mxu1 %v4869_v4  ;;  %v4920_v4 = vld [vmem:[%s6458_s3 + $0x480] sm:$0xff]  }
 0x397   :  { %4491 = vmatprep.subr.bf16.mxu1 %v4872_v5  ;;  %v1708_v5 = vcombine.high %v1692_v62, %v1692_v62 }
 0x398   :  { %4512 = vmatpush3.bf16.msra.mxu0 %v4871_v49  ;;  %v4923_v49 = vld [vmem:[%s6458_s3 + $0x4c8] sm:$0xff]  }
 0x399   :  { %4513 = vmatprep.subr.bf16.mxu0 %v4874_v6  ;;  %v1758_v6 = vcombine.high %v1748_v3, %v1748_v3 }
 0x39a   :  { %4492 = vmatpush3.bf16.msra.mxu1 %v4873_v19  ;;  %v4922_v19 = vld [vmem:[%s6458_s3 + $0x408] sm:$0xff]  }
 0x39b   :  { %4493 = vmatprep.subr.bf16.mxu1 %v4876_v59  ;;  %v4924_v59 = vld [vmem:[%s6458_s3 + $0x488] sm:$0xff]  }
 0x39c   :  { %4514 = vmatpush3.bf16.msra.mxu0 %v4875_v42  ;;  %v4927_v42 = vld [vmem:[%s6458_s3 + $0x4d0] sm:$0xff]  }
 0x39d   :  { %4515 = vmatprep.subr.bf16.mxu0 %v4878_v2  ;;  %v4926_v2 = vld [vmem:[%s6458_s3 + $0x410] sm:$0xff]  }
 0x39e   :  { %4494 = vmatpush3.bf16.msra.mxu1 %v4877_v7  ;;  %v4929_v7 = vld [vmem:[%s6458_s3 + $0x458] sm:$0xff]  }
 0x39f   :  { %4495 = vmatprep.subr.bf16.mxu1 %v4880_v9  ;;  %v4931_v9 = vld [vmem:[%s6458_s3 + $0x4d8] sm:$0xff]  }
 0x3a0   :  { %4516 = vmatpush3.bf16.msra.mxu0 %v4879_v10  ;;  %v4930_v10 = vld [vmem:[%s6458_s3 + $0x418] sm:$0xff]  }
 0x3a1   :  { %4517 = vmatprep.subr.bf16.mxu0 %v4882_v11  ;;  %v4933_v11 = vld [vmem:[%s6458_s3 + $0x460] sm:$0xff]  }
 0x3a2   :  { %4496 = vmatpush3.bf16.msra.mxu1 %v4881_v12  ;;  %v4932_v12 = vld [vmem:[%s6458_s3 + $0x498] sm:$0xff]  }
 0x3a3   :  { %4525 = vmatprep.subr.bf16.mxu1 %v4884_v14  ;;  %v4934_v14 = vld [vmem:[%s6458_s3 + $0x420] sm:$0xff]  }
 0x3a4   :  { %4518 = vmatpush3.bf16.msra.mxu0 %v4883_v15  ;;  %v4937_v15 = vld [vmem:[%s6458_s3 + $0x468] sm:$0xff]  }
 0x3a5   :  { %3570 = vmatmul.mubr.bf16.vlgmr.msra.gmra.mrb[16].mxu1 %v1685_v16  ;;  %4547 = vmatprep.subr.bf16.mxu0 %v4887_v17  ;;  %v4936_v16 = vld [vmem:[%s6458_s3 + $0x4a0] sm:$0xff]   ;;  %v4939_v17 = vld [vmem:[%s6458_s3 + $0x4e8] sm:$0xff]  }
 0x3a6   :  { %4526 = vmatpush3.bf16.msra.mxu1 %v4885_v18  ;;  %3649 = vmatprep.mubr.bf16.mxu1 %v1706_v20  ;;  %v4938_v18 = vld [vmem:[%s6458_s3 + $0x428] sm:$0xff]   ;;  %v1711_v20 = vcombine.high %v5975_v48, %v5975_v48 }
 0x3a7   :  { %3610 = vmatmul.mubr.bf16.vlgmr.msra.gmra.mrb[20].mxu0 %v1707_v23  ;;  %4527 = vmatprep.subr.bf16.mxu1 %v4889_v21  ;;  %v4941_v21 = vld [vmem:[%s6458_s3 + $0x470] sm:$0xff]   ;;  %v4957_v48 = vld [vmem:[%s6458_s3 + $0x588] sm:$0xff]  }
 0x3a8   :  { %4548 = vmatpush3.bf16.msra.mxu0 %v4888_v22  ;;  %3689 = vmatprep.mubr.bf16.mxu0 %v1710_v26  ;;  %v4940_v22 = vld [vmem:[%s6458_s3 + $0x4a8] sm:$0xff]   ;;  %v4943_v23 = vld [vmem:[%s6458_s3 + $0x4f0] sm:$0xff]   ;;  %v6094_v26 = vrot.slane %v1711_v20, %v5590_v56 }
 0x3a9   :  { %4549 = vmatprep.subr.bf16.mxu0 %v4891_v25  ;;  %v4942_v25 = vld [vmem:[%s6458_s3 + $0x430] sm:$0xff]  }
 0x3aa   :  { %4528 = vmatpush3.bf16.msra.mxu1 %v4890_v27  ;;  %v4945_v27 = vld [vmem:[%s6458_s3 + $0x478] sm:$0xff]   ;;  %v4990_v20 = vld [vmem:[%s6458_s3 + $0x650] sm:$0xff]  }
 0x3ab   :  { %4529 = vmatprep.subr.bf16.mxu1 %v4893_v24  ;;  %v4944_v24 = vld [vmem:[%s6458_s3 + $0x4b0] sm:$0xff]  }
 0x3ac   :  { %4550 = vmatpush3.bf16.msra.mxu0 %v4892_v29  ;;  %v4947_v29 = vld [vmem:[%s6458_s3 + $0x4f8] sm:$0xff]  }
 0x3ad   :  { %4551 = vmatprep.subr.bf16.mxu0 %v4895_v30  ;;  %v4946_v30 = vld [vmem:[%s6458_s3 + $0x438] sm:$0xff]  }
 0x3ae   :  { %4530 = vmatpush3.bf16.msra.mxu1 %v4894_v31  ;;  %v1727_v31 = vcombine.high %v6094_v26, %v6094_v26 }
 0x3af   :  { %4531 = vmatprep.subr.bf16.mxu1 %v4897_v32  ;;  %v4949_v32 = vld [vmem:[%s6458_s3 + $0x540] sm:$0xff]  }
 0x3b0   :  { %4552 = vmatpush3.bf16.msra.mxu0 %v4896_v34  ;;  %v4948_v34 = vld [vmem:[%s6458_s3 + $0x4b8] sm:$0xff]  }
 0x3b1   :  { %4553 = vmatprep.subr.bf16.mxu0 %v4899_v35  ;;  %v1734_v35 = vrot.slane %v5988_v52, %v5590_v56  ;;  %v4961_v52 = vld [vmem:[%s6458_s3 + $0x590] sm:$0xff]  }
 0x3b2   :  { %4532 = vmatpush3.bf16.msra.mxu1 %v4898_v36  ;;  %v4952_v36 = vld [vmem:[%s6458_s3 + $0x5c0] sm:$0xff]  }
 0x3b3   :  { %4533 = vmatprep.subr.bf16.mxu1 %v4901_v37  ;;  %v4950_v37 = vld [vmem:[%s6458_s3 + $0x500] sm:$0xff]  }
 0x3b4   :  { %4554 = vmatpush3.bf16.msra.mxu0 %v4900_v38  ;;  %v1755_v38 = vrot.slane %v1727_v31, %v5590_v56  ;;  %v5000_v31 = vld [vmem:[%s6458_s3 + $0x6e0] sm:$0xff]  }
 0x3b5   :  { %4555 = vmatprep.subr.bf16.mxu0 %v4903_v28  ;;  %v4954_v28 = vld [vmem:[%s6458_s3 + $0x548] sm:$0xff]  }
 0x3b6   :  { %4534 = vmatpush3.bf16.msra.mxu1 %v4902_v39  ;;  %v4953_v39 = vld [vmem:[%s6458_s3 + $0x580] sm:$0xff]  }
 0x3b7   :  { %4535 = vmatprep.subr.bf16.mxu1 %v4905_v40  ;;  %v1756_v40 = vcombine.high %v1734_v35, %v1734_v35 }
 0x3b8   :  { %4556 = vmatpush3.bf16.msra.mxu0 %v4904_v41  ;;  %v4956_v41 = vld [vmem:[%s6458_s3 + $0x5c8] sm:$0xff]  }
 0x3b9   :  { %4557 = vmatprep.subr.bf16.mxu0 %v4907_v43  ;;  %v1759_v43 = vcombine.high %v1755_v38, %v1755_v38 }
 0x3ba   :  { %4536 = vmatpush3.bf16.msra.mxu1 %v4906_v44  ;;  %v4955_v44 = vld [vmem:[%s6458_s3 + $0x508] sm:$0xff]  }
 0x3bb   :  { %4537 = vmatprep.subr.bf16.mxu1 %v4909_v47  ;;  %v4958_v47 = vld [vmem:[%s6458_s3 + $0x550] sm:$0xff]  }
 0x3bc   :  { %4558 = vmatpush3.bf16.msra.mxu0 %v4908_v50  ;;  %v4960_v50 = vld [vmem:[%s6458_s3 + $0x5d0] sm:$0xff]  }
 0x3bd   :  { %4559 = vmatprep.subr.bf16.mxu0 %v4911_v46  ;;  %v4959_v46 = vld [vmem:[%s6458_s3 + $0x510] sm:$0xff]  }
 0x3be   :  { %4538 = vmatpush3.bf16.msra.mxu1 %v4910_v51  ;;  %v4962_v51 = vld [vmem:[%s6458_s3 + $0x558] sm:$0xff]  }
 0x3bf   :  { %4539 = vmatprep.subr.bf16.mxu1 %v4913_v53  ;;  %v4964_v53 = vld [vmem:[%s6458_s3 + $0x5d8] sm:$0xff]  }
 0x3c0   :  { %4560 = vmatpush3.bf16.msra.mxu0 %v4912_v54  ;;  %v4963_v54 = vld [vmem:[%s6458_s3 + $0x518] sm:$0xff]  }
 0x3c1   :  { %4561 = vmatprep.subr.bf16.mxu0 %v4915_v55  ;;  %v4966_v55 = vld [vmem:[%s6458_s3 + $0x560] sm:$0xff]  }
 0x3c2   :  { %4540 = vmatpush3.bf16.msra.mxu1 %v4914_v57  ;;  %v4965_v57 = vld [vmem:[%s6458_s3 + $0x598] sm:$0xff]  }
 0x3c3   :  { %4569 = vmatprep.subr.bf16.mxu1 %v4917_v60  ;;  %v4967_v60 = vld [vmem:[%s6458_s3 + $0x520] sm:$0xff]  }
 0x3c4   :  { %4562 = vmatpush3.bf16.msra.mxu0 %v4916_v61  ;;  %v4970_v61 = vld [vmem:[%s6458_s3 + $0x568] sm:$0xff]  }
 0x3c5   :  { %3650 = vmatmul.mubr.bf16.vlgmr.msra.gmra.mrb[20].mxu1 %v1692_v62  ;;  %4591 = vmatprep.subr.bf16.mxu0 %v4919_v63  ;;  %v4969_v62 = vld [vmem:[%s6458_s3 + $0x5a0] sm:$0xff]   ;;  %v4972_v63 = vld [vmem:[%s6458_s3 + $0x5e8] sm:$0xff]  }
 0x3c6   :  { %4570 = vmatpush3.bf16.msra.mxu1 %v4918_v0  ;;  %3729 = vmatprep.mubr.bf16.mxu1 %v1748_v3  ;;  %v4971_v0 = vld [vmem:[%s6458_s3 + $0x528] sm:$0xff]   ;;  %v4974_v3 = vld [vmem:[%s6458_s3 + $0x570] sm:$0xff]  }
 0x3c7   :  { %3690 = vmatmul.mubr.bf16.vlgmr.msra.gmra.mrb[24].mxu0 %v1708_v5  ;;  %4571 = vmatprep.subr.bf16.mxu1 %v4921_v45  ;;  %v6188_v45 = vld [vmem:[#allocation3 + $0x18] sm:$0xff] }
 0x3c8   :  { %4592 = vmatpush3.bf16.msra.mxu0 %v4920_v4  ;;  %3769 = vmatprep.mubr.bf16.mxu0 %v1758_v6  ;;  %v4973_v4 = vld [vmem:[%s6458_s3 + $0x5a8] sm:$0xff]   ;;  %v4976_v5 = vld [vmem:[%s6458_s3 + $0x5f0] sm:$0xff]   ;;  %v6201_v6 = vrot.slane %v6188_v45, %v5590_v56 }
 0x3c9   :  { %4593 = vmatprep.subr.bf16.mxu0 %v4923_v49  ;;  %v4975_v49 = vld [vmem:[%s6458_s3 + $0x530] sm:$0xff]  }
 0x3ca   :  { %4572 = vmatpush3.bf16.msra.mxu1 %v4922_v19  ;;  %v4978_v19 = vld [vmem:[%s6458_s3 + $0x578] sm:$0xff]  }
 0x3cb   :  { %4573 = vmatprep.subr.bf16.mxu1 %v4925_v33  ;;  %v4977_v33 = vld [vmem:[%s6458_s3 + $0x5b0] sm:$0xff]  }
 0x3cc   :  { %4594 = vmatpush3.bf16.msra.mxu0 %v4924_v59  ;;  %v4980_v59 = vld [vmem:[%s6458_s3 + $0x5f8] sm:$0xff]  }
 0x3cd   :  { %4595 = vmatprep.subr.bf16.mxu0 %v4927_v42  ;;  %v4979_v42 = vld [vmem:[%s6458_s3 + $0x538] sm:$0xff]  }
 0x3ce   :  { %4574 = vmatpush3.bf16.msra.mxu1 %v4926_v2  ;;  %v1775_v2 = vcombine.high %v6201_v6, %v6201_v6 }
 0x3cf   :  { %4575 = vmatprep.subr.bf16.mxu1 %v4929_v7  ;;  %v4982_v7 = vld [vmem:[%s6458_s3 + $0x640] sm:$0xff]  }
 0x3d0   :  { %4596 = vmatpush3.bf16.msra.mxu0 %v4928_v8  ;;  %v4981_v8 = vld [vmem:[%s6458_s3 + $0x5b8] sm:$0xff]  }
 0x3d1   :  { %4597 = vmatprep.subr.bf16.mxu0 %v4931_v9  ;;  %v1741_v9 = vrot.slane %v6094_v26, %v5590_v56  ;;  %v4993_v26 = vld [vmem:[%s6458_s3 + $0x690] sm:$0xff]  }
 0x3d2   :  { %4576 = vmatpush3.bf16.msra.mxu1 %v4930_v10  ;;  %v4984_v10 = vld [vmem:[%s6458_s3 + $0x6c0] sm:$0xff]  }
 0x3d3   :  { %4577 = vmatprep.subr.bf16.mxu1 %v4933_v11  ;;  %v4983_v11 = vld [vmem:[%s6458_s3 + $0x600] sm:$0xff]  }
 0x3d4   :  { %4598 = vmatpush3.bf16.msra.mxu0 %v4932_v12  ;;  %v1797_v12 = vrot.slane %v1775_v2, %v5590_v56  ;;  %v5033_v2 = vld [vmem:[%s6458_s3 + $0x7e0] sm:$0xff]  }
 0x3d5   :  { %4599 = vmatprep.subr.bf16.mxu0 %v4935_v13  ;;  %v4986_v13 = vld [vmem:[%s6458_s3 + $0x648] sm:$0xff]  }
 0x3d6   :  { %4578 = vmatpush3.bf16.msra.mxu1 %v4934_v14  ;;  %v4985_v14 = vld [vmem:[%s6458_s3 + $0x680] sm:$0xff]  }
 0x3d7   :  { %4579 = vmatprep.subr.bf16.mxu1 %v4937_v15  ;;  %v1757_v15 = vcombine.high %v1741_v9, %v1741_v9 }
 0x3d8   :  { %4600 = vmatpush3.bf16.msra.mxu0 %v4936_v16  ;;  %v4988_v16 = vld [vmem:[%s6458_s3 + $0x6c8] sm:$0xff]  }
 0x3d9   :  { %4601 = vmatprep.subr.bf16.mxu0 %v4939_v17  ;;  %v1807_v17 = vcombine.high %v1797_v12, %v1797_v12 }
 0x3da   :  { %4580 = vmatpush3.bf16.msra.mxu1 %v4938_v18  ;;  %v4987_v18 = vld [vmem:[%s6458_s3 + $0x608] sm:$0xff]  }
 0x3db   :  { %4581 = vmatprep.subr.bf16.mxu1 %v4941_v21  ;;  %v4989_v21 = vld [vmem:[%s6458_s3 + $0x688] sm:$0xff]  }
 0x3dc   :  { %4602 = vmatpush3.bf16.msra.mxu0 %v4940_v22  ;;  %v4992_v22 = vld [vmem:[%s6458_s3 + $0x6d0] sm:$0xff]  }
 0x3dd   :  { %4603 = vmatprep.subr.bf16.mxu0 %v4943_v23  ;;  %v4991_v23 = vld [vmem:[%s6458_s3 + $0x610] sm:$0xff]  }
 0x3de   :  { %4582 = vmatpush3.bf16.msra.mxu1 %v4942_v25  ;;  %v4994_v25 = vld [vmem:[%s6458_s3 + $0x658] sm:$0xff]  }
 0x3df   :  { %4583 = vmatprep.subr.bf16.mxu1 %v4945_v27  ;;  %v4996_v27 = vld [vmem:[%s6458_s3 + $0x6d8] sm:$0xff]  }
 0x3e0   :  { %4604 = vmatpush3.bf16.msra.mxu0 %v4944_v24  ;;  %v4995_v24 = vld [vmem:[%s6458_s3 + $0x618] sm:$0xff]  }
 0x3e1   :  { %4605 = vmatprep.subr.bf16.mxu0 %v4947_v29  ;;  %v4998_v29 = vld [vmem:[%s6458_s3 + $0x660] sm:$0xff]  }
 0x3e2   :  { %4584 = vmatpush3.bf16.msra.mxu1 %v4946_v30  ;;  %v4997_v30 = vld [vmem:[%s6458_s3 + $0x698] sm:$0xff]  }
 0x3e3   :  { %4613 = vmatprep.subr.bf16.mxu1 %v4949_v32  ;;  %v4999_v32 = vld [vmem:[%s6458_s3 + $0x620] sm:$0xff]  }
 0x3e4   :  { %4606 = vmatpush3.bf16.msra.mxu0 %v4948_v34  ;;  %v5002_v34 = vld [vmem:[%s6458_s3 + $0x668] sm:$0xff]  }
 0x3e5   :  { %3730 = vmatmul.mubr.bf16.vlgmr.msra.gmra.mrb[24].mxu1 %v1734_v35  ;;  %4635 = vmatprep.subr.bf16.mxu0 %v4952_v36  ;;  %v5001_v35 = vld [vmem:[%s6458_s3 + $0x6a0] sm:$0xff]   ;;  %v5004_v36 = vld [vmem:[%s6458_s3 + $0x6e8] sm:$0xff]  }
 0x3e6   :  { %4614 = vmatpush3.bf16.msra.mxu1 %v4950_v37  ;;  %3809 = vmatprep.mubr.bf16.mxu1 %v1755_v38  ;;  %v5003_v37 = vld [vmem:[%s6458_s3 + $0x628] sm:$0xff]   ;;  %v1760_v38 = vcombine.high %v6188_v45, %v6188_v45 }
 0x3e7   :  { %3770 = vmatmul.mubr.bf16.vlgmr.msra.gmra.mrb[28].mxu0 %v1756_v40  ;;  %4615 = vmatprep.subr.bf16.mxu1 %v4954_v28  ;;  %v5006_v28 = vld [vmem:[%s6458_s3 + $0x670] sm:$0xff]   ;;  %v5022_v45 = vld [vmem:[%s6458_s3 + $0x788] sm:$0xff]  }
 0x3e8   :  { %4636 = vmatpush3.bf16.msra.mxu0 %v4953_v39  ;;  %3849 = vmatprep.mubr.bf16.mxu0 %v1759_v43  ;;  %v5005_v39 = vld [vmem:[%s6458_s3 + $0x6a8] sm:$0xff]   ;;  %v5008_v40 = vld [vmem:[%s6458_s3 + $0x6f0] sm:$0xff]   ;;  %v6307_v43 = vrot.slane %v1760_v38, %v5590_v56 }
 0x3e9   :  { %4637 = vmatprep.subr.bf16.mxu0 %v4956_v41  ;;  %v5007_v41 = vld [vmem:[%s6458_s3 + $0x630] sm:$0xff]  }
 0x3ea   :  { %4616 = vmatpush3.bf16.msra.mxu1 %v4955_v44  ;;  %v5010_v44 = vld [vmem:[%s6458_s3 + $0x678] sm:$0xff]  }
 0x3eb   :  { %4617 = vmatprep.subr.bf16.mxu1 %v4958_v47  ;;  %v5009_v47 = vld [vmem:[%s6458_s3 + $0x6b0] sm:$0xff]  }
 0x3ec   :  { %4638 = vmatpush3.bf16.msra.mxu0 %v4957_v48  ;;  %v5012_v48 = vld [vmem:[%s6458_s3 + $0x6f8] sm:$0xff]  }
 0x3ed   :  { %4639 = vmatprep.subr.bf16.mxu0 %v4960_v50  ;;  %v5011_v50 = vld [vmem:[%s6458_s3 + $0x638] sm:$0xff]  }
 0x3ee   :  { %4618 = vmatpush3.bf16.msra.mxu1 %v4959_v46  ;;  %v1776_v46 = vcombine.high %v6307_v43, %v6307_v43 }
 0x3ef   :  { %4619 = vmatprep.subr.bf16.mxu1 %v4962_v51  ;;  %v5014_v51 = vld [vmem:[%s6458_s3 + $0x740] sm:$0xff]  }
 0x3f0   :  { %4640 = vmatpush3.bf16.msra.mxu0 %v4961_v52  ;;  %v5013_v52 = vld [vmem:[%s6458_s3 + $0x6b8] sm:$0xff]  }
 0x3f1   :  { %4641 = vmatprep.subr.bf16.mxu0 %v4964_v53  ;;  %v1783_v53 = vrot.slane %v6201_v6, %v5590_v56  ;;  %v5026_v6 = vld [vmem:[%s6458_s3 + $0x790] sm:$0xff]  }
 0x3f2   :  { %4620 = vmatpush3.bf16.msra.mxu1 %v4963_v54  ;;  %v5017_v54 = vld [vmem:[%s6458_s3 + $0x7c0] sm:$0xff]  }
 0x3f3   :  { %4621 = vmatprep.subr.bf16.mxu1 %v4966_v55  ;;  %v5015_v55 = vld [vmem:[%s6458_s3 + $0x700] sm:$0xff]  }
 0x3f4   :  { %4642 = vmatpush3.bf16.msra.mxu0 %v4965_v57  ;;  %v1804_v57 = vrot.slane %v1776_v46, %v5590_v56 }
 0x3f5   :  { %4643 = vmatprep.subr.bf16.mxu0 %v4968_v58  ;;  %v5019_v58 = vld [vmem:[%s6458_s3 + $0x748] sm:$0xff]  }
 0x3f6   :  { %4622 = vmatpush3.bf16.msra.mxu1 %v4967_v60  ;;  %v5018_v60 = vld [vmem:[%s6458_s3 + $0x780] sm:$0xff]  }
 0x3f7   :  { %4623 = vmatprep.subr.bf16.mxu1 %v4970_v61  ;;  %v1805_v61 = vcombine.high %v1783_v53, %v1783_v53 }
 0x3f8   :  { %4644 = vmatpush3.bf16.msra.mxu0 %v4969_v62  ;;  %v5021_v62 = vld [vmem:[%s6458_s3 + $0x7c8] sm:$0xff]  }
 0x3f9   :  { %4645 = vmatprep.subr.bf16.mxu0 %v4972_v63  ;;  %v1808_v63 = vcombine.high %v1804_v57, %v1804_v57 }
 0x3fa   :  { %4624 = vmatpush3.bf16.msra.mxu1 %v4971_v0  ;;  %v5020_v0 = vld [vmem:[%s6458_s3 + $0x708] sm:$0xff]  }
 0x3fb   :  { %4625 = vmatprep.subr.bf16.mxu1 %v4974_v3  ;;  %v5023_v3 = vld [vmem:[%s6458_s3 + $0x750] sm:$0xff]  }
 0x3fc   :  { %4646 = vmatpush3.bf16.msra.mxu0 %v4973_v4  ;;  %v5025_v4 = vld [vmem:[%s6458_s3 + $0x7d0] sm:$0xff]  }
 0x3fd   :  { %4647 = vmatprep.subr.bf16.mxu0 %v4976_v5  ;;  %v5024_v5 = vld [vmem:[%s6458_s3 + $0x710] sm:$0xff]  }
 0x3fe   :  { %4626 = vmatpush3.bf16.msra.mxu1 %v4975_v49  ;;  %v5027_v49 = vld [vmem:[%s6458_s3 + $0x758] sm:$0xff]  }
 0x3ff   :  { %4627 = vmatprep.subr.bf16.mxu1 %v4978_v19  ;;  %v5029_v19 = vld [vmem:[%s6458_s3 + $0x7d8] sm:$0xff]  }
 0x400   :  { %4648 = vmatpush3.bf16.msra.mxu0 %v4977_v33  ;;  %v5028_v33 = vld [vmem:[%s6458_s3 + $0x718] sm:$0xff]  }
 0x401   :  { %4649 = vmatprep.subr.bf16.mxu0 %v4980_v59  ;;  %v5031_v59 = vld [vmem:[%s6458_s3 + $0x760] sm:$0xff]  }
 0x402   :  { %4628 = vmatpush3.bf16.msra.mxu1 %v4979_v42  ;;  %v5030_v42 = vld [vmem:[%s6458_s3 + $0x798] sm:$0xff]  }
 0x403   :  { %4657 = vmatprep.subr.bf16.mxu1 %v4982_v7  ;;  %v5032_v7 = vld [vmem:[%s6458_s3 + $0x720] sm:$0xff]  }
 0x404   :  { %4650 = vmatpush3.bf16.msra.mxu0 %v4981_v8  ;;  %v5035_v8 = vld [vmem:[%s6458_s3 + $0x768] sm:$0xff]  }
 0x405   :  { %3810 = vmatmul.mubr.bf16.vlgmr.msra.gmra.mrb[28].mxu1 %v1741_v9  ;;  %4679 = vmatprep.subr.bf16.mxu0 %v4984_v10  ;;  %v5034_v9 = vld [vmem:[%s6458_s3 + $0x7a0] sm:$0xff]   ;;  %v5037_v10 = vld [vmem:[%s6458_s3 + $0x7e8] sm:$0xff]  }
 0x406   :  { %4658 = vmatpush3.bf16.msra.mxu1 %v4983_v11  ;;  %3889 = vmatprep.mubr.bf16.mxu1 %v1797_v12  ;;  %v5036_v11 = vld [vmem:[%s6458_s3 + $0x728] sm:$0xff]   ;;  %v5039_v12 = vld [vmem:[%s6458_s3 + $0x770] sm:$0xff]  }
 0x407   :  { %3850 = vmatmul.mubr.bf16.vlgmr.msra.gmra.mrb[32].mxu0 %v1757_v15  ;;  %4659 = vmatprep.subr.bf16.mxu1 %v4986_v13  ;;  %v4125_v15 = vld [vmem:[%s6457_s2 + $0x18] ss:$0 sm:$0xff] }
 0x408   :  { %4680 = vmatpush3.bf16.msra.mxu0 %v4985_v14  ;;  %3929 = vmatprep.mubr.bf16.mxu0 %v1807_v17  ;;  %v5038_v14 = vld [vmem:[%s6458_s3 + $0x7a8] sm:$0xff]   ;;  %v5041_v17 = vld [vmem:[%s6458_s3 + $0x7f0] sm:$0xff]  }
 0x409   :  { %4681 = vmatprep.subr.bf16.mxu0 %v4988_v16 }
 0x40a   :  { %4660 = vmatpush3.bf16.msra.mxu1 %v4987_v18 }
 0x40b   :  { %4661 = vmatprep.subr.bf16.mxu1 %v4990_v20 }
 0x40c   :  { %4682 = vmatpush3.bf16.msra.mxu0 %v4989_v21 }
 0x40d   :  { %4683 = vmatprep.subr.bf16.mxu0 %v4992_v22  ;;  %v5040_v22 = vld [vmem:[%s6458_s3 + $0x730] sm:$0xff]  }
 0x40e   :  { %4662 = vmatpush3.bf16.msra.mxu1 %v4991_v23 }
 0x40f   :  { %4663 = vmatprep.subr.bf16.mxu1 %v4994_v25 }
 0x410   :  { %4684 = vmatpush3.bf16.msra.mxu0 %v4993_v26  ;;  %v5043_v26 = vld [vmem:[%s6458_s3 + $0x778] sm:$0xff]  }
 0x411   :  { %4685 = vmatprep.subr.bf16.mxu0 %v4996_v27 }
 0x412   :  { %4664 = vmatpush3.bf16.msra.mxu1 %v4995_v24 }
 0x413   :  { %4665 = vmatprep.subr.bf16.mxu1 %v4998_v29 }
 0x414   :  { %4686 = vmatpush3.bf16.msra.mxu0 %v4997_v30  ;;  %v5042_v30 = vld [vmem:[%s6458_s3 + $0x7b0] sm:$0xff]  }
 0x415   :  { %4687 = vmatprep.subr.bf16.mxu0 %v5000_v31 }
 0x416   :  { %4666 = vmatpush3.bf16.msra.mxu1 %v4999_v32  ;;  %v5045_v32 = vld [vmem:[%s6458_s3 + $0x7f8] sm:$0xff]  }
 0x417   :  { %4667 = vmatprep.subr.bf16.mxu1 %v5002_v34 }
 0x418   :  { %4688 = vmatpush3.bf16.msra.mxu0 %v5001_v35  ;;  %v5044_v35 = vld [vmem:[%s6458_s3 + $0x738] sm:$0xff]  }
 0x419   :  { %4689 = vmatprep.subr.bf16.mxu0 %v5004_v36  ;;  %v5046_v36 = vld [vmem:[%s6458_s3 + $0x7b8] sm:$0xff]  }
 0x41a   :  { %4668 = vmatpush3.bf16.msra.mxu1 %v5003_v37  ;;  %v1790_v37 = vrot.slane %v6307_v43, %v5590_v56 }
 0x41b   :  { %4669 = vmatprep.subr.bf16.mxu1 %v5006_v28 }
 0x41c   :  { %4690 = vmatpush3.bf16.msra.mxu0 %v5005_v39  ;;  %v1806_v38 = vcombine.high %v1790_v37, %v1790_v37 }
 0x41d   :  { %4691 = vmatprep.subr.bf16.mxu0 %v5008_v40 }
 0x41e   :  { %4670 = vmatpush3.bf16.msra.mxu1 %v5007_v41 }
 0x41f   :  { %4671 = vmatprep.subr.bf16.mxu1 %v5010_v44 }
 0x420   :  { %4692 = vmatpush3.bf16.msra.mxu0 %v5009_v47 }
 0x421   :  { %4693 = vmatprep.subr.bf16.mxu0 %v5012_v48 }
 0x422   :  { %4672 = vmatpush3.bf16.msra.mxu1 %v5011_v50 }
 0x423   :  { %4701 = vmatprep.subr.bf16.mxu1 %v5014_v51 }
 0x424   :  { %4694 = vmatpush3.bf16.msra.mxu0 %v5013_v52 }
 0x425   :  { %3890 = vmatmul.mubr.bf16.vlgmr.msra.gmra.mrb[32].mxu1 %v1783_v53  ;;  %4723 = vmatprep.subr.bf16.mxu0 %v5017_v54 }
 0x426   :  { %4702 = vmatpush3.bf16.msra.mxu1 %v5015_v55  ;;  %3969 = vmatprep.mubr.bf16.mxu1 %v1804_v57 }
 0x427   :  { %3930 = vmatmul.mubr.bf16.vlgmr.msra.gmra.mrb[36].mxu0 %v1805_v61  ;;  %4703 = vmatprep.subr.bf16.mxu1 %v5019_v58 }
 0x428   :  { %4724 = vmatpush3.bf16.msra.mxu0 %v5018_v60  ;;  %4009 = vmatprep.mubr.bf16.mxu0 %v1808_v63 }
 0x429   :  { %4725 = vmatprep.subr.bf16.mxu0 %v5021_v62 }
 0x42a   :  { %4704 = vmatpush3.bf16.msra.mxu1 %v5020_v0 }
 0x42b   :  { %4705 = vmatprep.subr.bf16.mxu1 %v5023_v3 }
 0x42c   :  { %4726 = vmatpush3.bf16.msra.mxu0 %v5022_v45 }
 0x42d   :  { %4727 = vmatprep.subr.bf16.mxu0 %v5025_v4 }
 0x42e   :  { %4706 = vmatpush3.bf16.msra.mxu1 %v5024_v5 }
 0x42f   :  { %4707 = vmatprep.subr.bf16.mxu1 %v5027_v49 }
 0x430   :  { %4728 = vmatpush3.bf16.msra.mxu0 %v5026_v6 }
 0x431   :  { %4729 = vmatprep.subr.bf16.mxu0 %v5029_v19 }
 0x432   :  { %4708 = vmatpush3.bf16.msra.mxu1 %v5028_v33 }
 0x433   :  { %4709 = vmatprep.subr.bf16.mxu1 %v5031_v59 }
 0x434   :  { %4730 = vmatpush3.bf16.msra.mxu0 %v5030_v42 }
 0x435   :  { %4731 = vmatprep.subr.bf16.mxu0 %v5033_v2 }
 0x436   :  { %4710 = vmatpush3.bf16.msra.mxu1 %v5032_v7 }
 0x437   :  { %4711 = vmatprep.subr.bf16.mxu1 %v5035_v8 }
 0x438   :  { %4732 = vmatpush3.bf16.msra.mxu0 %v5034_v9  ;;  %v4409_v13 = vpop.f32.mrb[8].mxu1  ;;  %v5047_v9 = vld [vmem:[%s6456_s1 + $0x10] sm:$0xff]  }
 0x439   :  { %v4410_v16 = vpop.f32.mrb[9].mxu1  ;;  %4733 = vmatprep.subr.bf16.mxu0 %v5037_v10  ;;  %v5048_v10 = vld [vmem:[%s6456_s1 + $0x18] sm:$0xff]  }
 0x43a   :  { %v4411_v18 = vadd.f32 %v4410_v16, %v4409_v13  ;;  %4712 = vmatpush3.bf16.msra.mxu1 %v5036_v11  ;;  %v4412_v20 = vpop.f32.mrb[10].mxu1  ;;  %v4431_v21 = vpop.f32.mrb[12].mxu0 }
 0x43b   :  { %v4413_v23 = vpop.f32.mrb[11].mxu1  ;;  %v4432_v25 = vpop.f32.mrb[13].mxu0  ;;  %4713 = vmatprep.subr.bf16.mxu1 %v5039_v12 }
 0x43c   :  { %v3412_v27 = vadd.f32 %v4411_v18, %v4125_v15  ;;  %v4433_v24 = vadd.f32 %v4432_v25, %v4431_v21  ;;  %4734 = vmatpush3.bf16.msra.mxu0 %v5038_v14  ;;  %v4434_v29 = vpop.f32.mrb[14].mxu0 }
 0x43d   :  { %v4435_v31 = vpop.f32.mrb[15].mxu0  ;;  %4735 = vmatprep.subr.bf16.mxu0 %v5041_v17 }
 0x43e   :  { %v3452_v34 = vadd.f32 %v4433_v24, %v3412_v27  ;;  %4714 = vmatpush3.bf16.msra.mxu1 %v5040_v22 }
 0x43f   :  { %4715 = vmatprep.subr.bf16.mxu1 %v5043_v26 }
 0x440   :  { %4736 = vmatpush3.bf16.msra.mxu0 %v5042_v30 }
 0x441   :  { %4737 = vmatprep.subr.bf16.mxu0 %v5045_v32 }
 0x442   :  { %4716 = vmatpush3.bf16.msra.mxu1 %v5044_v35 }
 0x443   :  { %4758 = vmatprep.subr.bf16.mxu1 %v5087_v1 }
 0x444   :  { %4738 = vmatpush3.bf16.msra.mxu0 %v5046_v36 }
 0x445   :  { %3970 = vmatmul.mubr.bf16.vlgmr.msra.gmra.mrb[36].mxu1 %v1790_v37 }
 0x446   :  { %4762 = vmatprep.mubr.msk.bf16.mxu1 %vm5088_vm12, %v5087_v1  ;;  %4759 = vmatpush3.bf16.msra.mxu1 %v5047_v9 }
 0x447   :  { %4010 = vmatmul.mubr.bf16.vlgmr.msra.gmra.mrb[40].mxu0 %v1806_v38  ;;  %4760 = vmatprep.subr.bf16.mxu1 %v5087_v1 }
 0x44a   :  { %4761 = vmatpush3.bf16.msra.mxu1 %v5048_v10 }
 0x458   :  { %v4453_v28 = vpop.f32.mrb[12].mxu1 }
 0x459   :  { %v4454_v39 = vpop.f32.mrb[13].mxu1 }
 0x45a   :  { %v4455_v40 = vadd.f32 %v4454_v39, %v4453_v28  ;;  %v4456_v41 = vpop.f32.mrb[14].mxu1  ;;  %v4475_v44 = vpop.f32.mrb[16].mxu0 }
 0x45b   :  { %v4457_v47 = vpop.f32.mrb[15].mxu1  ;;  %v4476_v48 = vpop.f32.mrb[17].mxu0 }
 0x45c   :  { %v3492_v50 = vadd.f32 %v4455_v40, %v3452_v34  ;;  %v4477_v46 = vadd.f32 %v4476_v48, %v4475_v44  ;;  %v4478_v56 = vpop.f32.mrb[18].mxu0 }
 0x45d   :  { %v4479_v43 = vpop.f32.mrb[19].mxu0 }
 0x45e   :  { %v3532_v51 = vadd.f32 %v4477_v46, %v3492_v50 }
 0x478   :  { %v4497_v52 = vpop.f32.mrb[16].mxu1 }
 0x479   :  { %v4498_v53 = vpop.f32.mrb[17].mxu1 }
 0x47a   :  { %v4499_v54 = vadd.f32 %v4498_v53, %v4497_v52  ;;  %v4500_v55 = vpop.f32.mrb[18].mxu1  ;;  %v4519_v57 = vpop.f32.mrb[20].mxu0 }
 0x47b   :  { %v4501_v58 = vpop.f32.mrb[19].mxu1  ;;  %v4520_v60 = vpop.f32.mrb[21].mxu0 }
 0x47c   :  { %v3572_v61 = vadd.f32 %v4499_v54, %v3532_v51  ;;  %v4521_v62 = vadd.f32 %v4520_v60, %v4519_v57  ;;  %v4522_v63 = vpop.f32.mrb[22].mxu0 }
 0x47d   :  { %v4523_v0 = vpop.f32.mrb[23].mxu0 }
 0x47e   :  { %v3612_v3 = vadd.f32 %v4521_v62, %v3572_v61 }
 0x498   :  { %v4541_v45 = vpop.f32.mrb[20].mxu1 }
 0x499   :  { %v4542_v4 = vpop.f32.mrb[21].mxu1 }
 0x49a   :  { %v4543_v5 = vadd.f32 %v4542_v4, %v4541_v45  ;;  %v4544_v49 = vpop.f32.mrb[22].mxu1  ;;  %v4563_v6 = vpop.f32.mrb[24].mxu0  ;;  %v4382_v45 = vld [vmem:[%s6457_s2 + $0x20] ss:$0 sm:$0xff] }
 0x49b   :  { %v4545_v19 = vpop.f32.mrb[23].mxu1  ;;  %v4564_v33 = vpop.f32.mrb[25].mxu0 }
 0x49c   :  { %v3652_v59 = vadd.f32 %v4543_v5, %v3612_v3  ;;  %v4565_v42 = vadd.f32 %v4564_v33, %v4563_v6  ;;  %v4566_v2 = vpop.f32.mrb[26].mxu0 }
 0x49d   :  { %v4567_v7 = vpop.f32.mrb[27].mxu0 }
 0x49e   :  { %v3692_v8 = vadd.f32 %v4565_v42, %v3652_v59 }
 0x4b8   :  { %v4585_v11 = vpop.f32.mrb[24].mxu1 }
 0x4b9   :  { %v4586_v12 = vpop.f32.mrb[25].mxu1 }
 0x4ba   :  { %v4587_v13 = vadd.f32 %v4586_v12, %v4585_v11  ;;  %v4588_v14 = vpop.f32.mrb[26].mxu1  ;;  %v4607_v15 = vpop.f32.mrb[28].mxu0 }
 0x4bb   :  { %v4589_v16 = vpop.f32.mrb[27].mxu1  ;;  %v4608_v17 = vpop.f32.mrb[29].mxu0 }
 0x4bc   :  { %v3732_v18 = vadd.f32 %v4587_v13, %v3692_v8  ;;  %v4609_v20 = vadd.f32 %v4608_v17, %v4607_v15  ;;  %v4610_v21 = vpop.f32.mrb[30].mxu0 }
 0x4bd   :  { %v4611_v22 = vpop.f32.mrb[31].mxu0 }
 0x4be   :  { %v3772_v23 = vadd.f32 %v4609_v20, %v3732_v18 }
 0x4d8   :  { %v4629_v25 = vpop.f32.mrb[28].mxu1 }
 0x4d9   :  { %v4630_v26 = vpop.f32.mrb[29].mxu1 }
 0x4da   :  { %v4631_v27 = vadd.f32 %v4630_v26, %v4629_v25  ;;  %v4632_v24 = vpop.f32.mrb[30].mxu1  ;;  %v4651_v29 = vpop.f32.mrb[32].mxu0 }
 0x4db   :  { %v4633_v30 = vpop.f32.mrb[31].mxu1  ;;  %v4652_v1 = vpop.f32.mrb[33].mxu0 }
 0x4dc   :  { %v3812_v31 = vadd.f32 %v4631_v27, %v3772_v23  ;;  %v4653_v32 = vadd.f32 %v4652_v1, %v4651_v29  ;;  %v4654_v34 = vpop.f32.mrb[34].mxu0 }
 0x4dd   :  { %v4655_v35 = vpop.f32.mrb[35].mxu0 }
 0x4de   :  { %v3852_v36 = vadd.f32 %v4653_v32, %v3812_v31 }
 0x4f8   :  { %v4673_v37 = vpop.f32.mrb[32].mxu1 }
 0x4f9   :  { %v4674_v38 = vpop.f32.mrb[33].mxu1 }
 0x4fa   :  { %v4675_v28 = vadd.f32 %v4674_v38, %v4673_v37  ;;  %v4676_v39 = vpop.f32.mrb[34].mxu1  ;;  %v4695_v40 = vpop.f32.mrb[36].mxu0 }
 0x4fb   :  { %v4677_v41 = vpop.f32.mrb[35].mxu1  ;;  %v4696_v44 = vpop.f32.mrb[37].mxu0 }
 0x4fc   :  { %v3892_v47 = vadd.f32 %v4675_v28, %v3852_v36  ;;  %v4697_v48 = vadd.f32 %v4696_v44, %v4695_v40  ;;  %v4698_v50 = vpop.f32.mrb[38].mxu0 }
 0x4fd   :  { %v4699_v46 = vpop.f32.mrb[39].mxu0 }
 0x4fe   :  { %v3932_v56 = vadd.f32 %v4697_v48, %v3892_v47 }
 0x518   :  { %v4717_v43 = vpop.f32.mrb[36].mxu1 }
 0x519   :  { %v4718_v51 = vpop.f32.mrb[37].mxu1 }
 0x51a   :  { %v4719_v52 = vadd.f32 %v4718_v51, %v4717_v43  ;;  %v4720_v53 = vpop.f32.mrb[38].mxu1  ;;  %v4739_v54 = vpop.f32.mrb[40].mxu0 }
 0x51b   :  { %v4721_v55 = vpop.f32.mrb[39].mxu1  ;;  %v4740_v57 = vpop.f32.mrb[41].mxu0 }
 0x51c   :  { %v3972_v58 = vadd.f32 %v4719_v52, %v3932_v56  ;;  %v4741_v60 = vadd.f32 %v4740_v57, %v4739_v54  ;;  %v4742_v61 = vpop.f32.mrb[42].mxu0 }
 0x51d   :  { %v4743_v62 = vpop.f32.mrb[43].mxu0 }
 0x51e   :  { %v4012_v63 = vadd.f32 %v4741_v60, %v3972_v58 }
 0x520   :  { %v4017_v0 = vmax.f32 %v4012_v63, 0.0 }
 0x522   :  { %v4018_v3 = vpack.c.bf16 %v4017_v0, %v4017_v0 }
 0x524   :  { %4763 = vmatmul.mubr.msk.bf16.vlgmr.msra.gmra.mrb[40].mxu1 %vm4035_vm11, %v4018_v3 }
 0x5f7   :  { %v4073_v4 = vpop.f32.mrb[40].mxu1 }
 0x5f8   :  { %v4074_v5 = vadd.f32 %v4382_v45, %v4073_v4  ;;  %v4764_v49 = vpop.f32.mrb[41].mxu1 }
 0x5f9   :  { %v4076_v6 = vpop.f32.mrb[42].mxu1 }
 0x5fa   :  { %v4079_v19 = vmax.f32 %v4074_v5, 0.0  ;;  %v4765_v33 = vpop.f32.mrb[43].mxu1 }
 0x5fc   :  { %4080 = vst [vmem:[#allocation4] sm:$0x3] %v4079_v19 }
 0x5fd   :  { %5064 = shalt.err (!%p5061_p4)
}
 0x5fe   :  { %s5065_s2 = scalar_lea.hbm %s6459_s4, 32 }
 0x5ff   :  { %p5066_p5 = scmp.ne.s32.totalorder %s6459_s4, %s5065_s2  ;;  %p5069_p6 = scmp.lt.u32.totalorder %s5065_s2, %s6459_s4 }
 0x601   :  { %p5071_p7 = pnand %p5069_p6, %p5066_p5 }
 0x603   :  { %5074 = shalt.err (!%p5071_p7)
}
 0x604   :  { %4090 = dma.vmem_to_hbm [thread:$0]  %s4088_s16, 32, %s6459_s4, [#allocation5]  }
 0x605   :  { %5075 = dma.done.wait [#allocation5], 32  }
 0x606   :  { %5076 = vsyncadd [#allocation5], 4294967264 }
 0x607   :  { %4094 = vsyncpa [#allocation5], 1 }

</bundles_post_ra>
